<compile_context>
chip_gen: v7x
topology: tpu7x:2x2x1
jax: 0.10.0
libtpu: 0.0.40
codegen_flags: <defaults>
</compile_context>

<pallas_src>
import math

import jax
import jax.numpy as jnp
import numpy as np
from jax.experimental import pallas as pl
from jax.experimental.pallas import tpu as pltpu

_EPS = 1e-5  # nn.BatchNorm2d default eps


# --------------------------------------------------------------------------
# in-kernel helpers
# --------------------------------------------------------------------------
def _conv_taps(act, w_ref, offsets, q):
    """3x3 conv over a flattened, zero-ring padded image.

    act:    (C_in, PP) f32 activation in padded-flat layout (pad ring == 0).
    w_ref:  (9, C_out, C_in) bf16 weight ref, tap index t = dh*3 + dw.
    Returns (C_out, q) f32 conv output over the contiguous range of padded-flat
    positions that covers every valid output pixel.
    """
    c_out = w_ref.shape[1]
    acc = jnp.zeros((c_out, q), jnp.float32)
    for t, off in enumerate(offsets):
        tap = act[:, off:off + q]                       # static lane slice
        w_t = w_ref[t].astype(jnp.float32)              # (C_out, C_in)
        acc = acc + jnp.dot(w_t, tap, preferred_element_type=jnp.float32)
    return acc


def _accum_stats(acc, mask_q, sum_ref, ssq_ref):
    """Accumulate per-channel sum / sum-of-squares over valid pixels only."""
    masked = acc * mask_q                               # zero the pad-ring garbage
    sum_ref[...] += jnp.sum(masked, axis=1, keepdims=True)
    ssq_ref[...] += jnp.sum(masked * acc, axis=1, keepdims=True)


def _bn_affine(ssum, ssq, gamma, beta, count):
    """Fold training-mode BatchNorm into y = scale*x + shift (C,1 vectors)."""
    mean = ssum / count
    var = jnp.maximum(ssq / count - mean * mean, 0.0)   # biased variance, clamped
    scale = gamma * jax.lax.rsqrt(var + _EPS)
    shift = beta - mean * scale
    return scale, shift


# --------------------------------------------------------------------------
# forward pass
# --------------------------------------------------------------------------
@jax.jit
def residual_block(x, params):
    """x: (N, C, H, W) float32 -> (N, C, H, W) float32 (PyTorch NCHW layout)."""
    n, c, h, w = x.shape
    wp, hp = w + 2, h + 2
    pp = hp * wp                     # pixels per padded image (flat)
    p0 = wp + 1                      # padded-flat index of output pixel (0, 0)
    q = h * wp - 2                   # contiguous padded-flat range covering all outputs
    offsets = tuple(p0 + (dh - 1) * wp + (dw - 1)
                    for dh in range(3) for dw in range(3))
    valid_count = float(n * h * w)

    # ---- wrapper-side glue: ONE spatial pad (the old 9x im2col is gone) ----
    xpad = jnp.pad(x.astype(jnp.float32), ((0, 0), (0, 0), (1, 1), (1, 1)))
    xpf32 = xpad.reshape(n, c, pp)                 # f32 padded-flat (residual source)
    xpf16 = xpf32.astype(jnp.bfloat16)             # bf16 conv1 input (halved HBM bytes)
    w1 = params["w1"].astype(jnp.bfloat16)
    w2 = params["w2"].astype(jnp.bfloat16)

    idx = jnp.arange(pp, dtype=jnp.int32)
    row_i, col_i = idx // wp, idx % wp
    mask = (((row_i >= 1) & (row_i <= h) & (col_i >= 1) & (col_i <= w))
            .astype(jnp.float32))[None, :]          # (1, PP): 1 on real pixels, 0 on ring

    # ---------------- kernel bodies (close over static ints) ----------------
    def conv1_stats_kernel(x_ref, w_ref, mask_ref, s_ref, sum_ref, ssq_ref):
        i = pl.program_id(0)

        @pl.when(i == 0)
        def _init():
            sum_ref[...] = jnp.zeros_like(sum_ref)
            ssq_ref[...] = jnp.zeros_like(ssq_ref)

        act = x_ref[0].astype(jnp.float32)              # (C, PP)
        acc = _conv_taps(act, w_ref, offsets, q)        # (C, Q) f32 pre-BN conv1
        # Store in padded-flat layout with a zeroed ring so stage 2 can take
        # its conv taps directly from this buffer.
        s_ref[0] = jnp.zeros((c, pp), jnp.float32)
        s_ref[0, :, p0:p0 + q] = acc
        _accum_stats(acc, mask_ref[:, p0:p0 + q], sum_ref, ssq_ref)

    def bn1_relu_conv2_stats_kernel(s1_ref, sc_ref, sh_ref, w_ref, mask_ref,
                                    s2_ref, sum_ref, ssq_ref):
        i = pl.program_id(0)

        @pl.when(i == 0)
        def _init():
            sum_ref[...] = jnp.zeros_like(sum_ref)
            ssq_ref[...] = jnp.zeros_like(ssq_ref)

        s1 = s1_ref[0]                                             # (C, PP) f32
        y1 = jnp.maximum(s1 * sc_ref[...] + sh_ref[...], 0.0)      # bn1 + relu (fused)
        y1 = y1 * mask_ref[...]                                    # keep pad ring at 0
        y1 = y1.astype(jnp.bfloat16).astype(jnp.float32)           # bf16 conv-operand policy
        acc = _conv_taps(y1, w_ref, offsets, q)                    # (C, Q) f32 pre-BN conv2
        s2_ref[0] = acc
        _accum_stats(acc, mask_ref[:, p0:p0 + q], sum_ref, ssq_ref)

    def bn2_add_relu_kernel(s2_ref, sc_ref, sh_ref, res_ref, out_ref):
        s2 = s2_ref[0]                                             # (C, Q)
        res = res_ref[0][:, p0:p0 + q]                             # exact f32 residual
        out_ref[0] = jnp.maximum(s2 * sc_ref[...] + sh_ref[...] + res, 0.0)

    # ---------------------------- pallas calls ------------------------------
    stat_sd = jax.ShapeDtypeStruct((c, 1), jnp.float32)
    vmem = dict(vmem_limit_bytes=32 * 1024 * 1024)
    conv_flops = 2 * 9 * c * c * n * q

    # stage 1: conv1 + BN1 statistics
    s1, sum1, ssq1 = pl.pallas_call(
        conv1_stats_kernel,
        grid=(n,),
        in_specs=[
            pl.BlockSpec((1, c, pp), lambda i: (i, 0, 0)),   # padded x (bf16)
            pl.BlockSpec((9, c, c), lambda i: (0, 0, 0)),    # w1 (resident)
            pl.BlockSpec((1, pp), lambda i: (0, 0)),         # valid-pixel mask (resident)
        ],
        out_specs=[
            pl.BlockSpec((1, c, pp), lambda i: (i, 0, 0)),   # pre-BN conv1 (padded-flat)
            pl.BlockSpec((c, 1), lambda i: (0, 0)),          # sum   accumulator
            pl.BlockSpec((c, 1), lambda i: (0, 0)),          # sumsq accumulator
        ],
        out_shape=[jax.ShapeDtypeStruct((n, c, pp), jnp.float32), stat_sd, stat_sd],
        compiler_params=pltpu.CompilerParams(
            dimension_semantics=("arbitrary",), **vmem),
        cost_estimate=pl.CostEstimate(
            flops=conv_flops, transcendentals=0,
            bytes_accessed=xpf16.size * 2 + w1.size * 2 + mask.size * 4
            + n * c * pp * 4 + 2 * c * 4),
    )(xpf16, w1, mask)

    scale1, shift1 = _bn_affine(sum1, ssq1, params["g1"], params["be1"], valid_count)

    # stage 2: (bn1 + relu fused) + conv2 + BN2 statistics -- y1 never hits HBM
    s2, sum2, ssq2 = pl.pallas_call(
        bn1_relu_conv2_stats_kernel,
        grid=(n,),
        in_specs=[
            pl.BlockSpec((1, c, pp), lambda i: (i, 0, 0)),   # s1 (pre-BN conv1)
            pl.BlockSpec((c, 1), lambda i: (0, 0)),          # scale1
            pl.BlockSpec((c, 1), lambda i: (0, 0)),          # shift1
            pl.BlockSpec((9, c, c), lambda i: (0, 0, 0)),    # w2
            pl.BlockSpec((1, pp), lambda i: (0, 0)),         # mask
        ],
        out_specs=[
            pl.BlockSpec((1, c, q), lambda i: (i, 0, 0)),    # pre-BN conv2
            pl.BlockSpec((c, 1), lambda i: (0, 0)),
            pl.BlockSpec((c, 1), lambda i: (0, 0)),
        ],
        out_shape=[jax.ShapeDtypeStruct((n, c, q), jnp.float32), stat_sd, stat_sd],
        compiler_params=pltpu.CompilerParams(
            dimension_semantics=("arbitrary",), **vmem),
        cost_estimate=pl.CostEstimate(
            flops=conv_flops + 4 * n * c * pp, transcendentals=0,
            bytes_accessed=n * c * pp * 4 + w2.size * 2 + mask.size * 4
            + n * c * q * 4 + 2 * c * 4),
    )(s1, scale1, shift1, w2, mask)

    scale2, shift2 = _bn_affine(sum2, ssq2, params["g2"], params["be2"], valid_count)

    # stage 3: bn2 + residual add + relu
    out_q = pl.pallas_call(
        bn2_add_relu_kernel,
        grid=(n,),
        in_specs=[
            pl.BlockSpec((1, c, q), lambda i: (i, 0, 0)),    # s2
            pl.BlockSpec((c, 1), lambda i: (0, 0)),          # scale2
            pl.BlockSpec((c, 1), lambda i: (0, 0)),          # shift2
            pl.BlockSpec((1, c, pp), lambda i: (i, 0, 0)),   # padded f32 x (residual)
        ],
        out_specs=pl.BlockSpec((1, c, q), lambda i: (i, 0, 0)),
        out_shape=jax.ShapeDtypeStruct((n, c, q), jnp.float32),
        compiler_params=pltpu.CompilerParams(
            dimension_semantics=("parallel",), **vmem),
        cost_estimate=pl.CostEstimate(
            flops=4 * n * c * q, transcendentals=0,
            bytes_accessed=n * c * q * 8 + n * c * pp * 4),
    )(s2, scale2, shift2, xpf32)

    # drop the padding ring and restore (N, C, H, W)
    out_pf = jnp.pad(out_q, ((0, 0), (0, 0), (p0, pp - p0 - q)))
    out = out_pf.reshape(n, c, hp, wp)[:, :, 1:-1, 1:-1]
    return out


# --------------------------------------------------------------------------
# parameters (PyTorch-style init) and pure-JAX reference
# --------------------------------------------------------------------------
def init_params(key, channels):
    """Conv2d-style kaiming-uniform bound init; BN gamma=1, beta=0.

    Conv weights stored as (9, C_out, C_in) with tap index t = dh*3 + dw.
    Biases are kept (the nn.Module has them) but the kernels omit them: a
    per-channel bias added before training-mode BN cancels exactly.
    """
    k1, k2, k3, k4 = jax.random.split(key, 4)
    fan_in = channels * 9
    bound = 1.0 / math.sqrt(fan_in)
    w1 = jax.random.uniform(k1, (9, channels, channels), jnp.float32, -bound, bound)
    b1 = jax.random.uniform(k2, (channels,), jnp.float32, -bound, bound)
    w2 = jax.random.uniform(k3, (9, channels, channels), jnp.float32, -bound, bound)
    b2 = jax.random.uniform(k4, (channels,), jnp.float32, -bound, bound)
    ones = jnp.ones((channels, 1), jnp.float32)
    zeros = jnp.zeros((channels, 1), jnp.float32)
    return dict(w1=w1, b1=b1, g1=ones, be1=zeros,
                w2=w2, b2=b2, g2=ones, be2=zeros)


def reference(x, params):
    """Pure-JAX reference mirroring the kernel's mixed-precision policy
    (conv inputs/weights rounded to bf16, all arithmetic in f32, f32 residual,
    conv biases included -- they cancel under train-mode BN)."""
    cch = x.shape[1]
    f32 = jnp.float32
    xb = x.astype(jnp.bfloat16).astype(f32)

    def conv(inp, w9, b):
        we = w9.astype(jnp.bfloat16).astype(f32).reshape(3, 3, cch, cch)
        w_oihw = jnp.transpose(we, (2, 3, 0, 1))
        y = jax.lax.conv_general_dilated(
            inp, w_oihw, window_strides=(1, 1), padding=((1, 1), (1, 1)),
            dimension_numbers=("NCHW", "OIHW", "NCHW"),
            precision=jax.lax.Precision.HIGHEST)
        return y + b.reshape(1, -1, 1, 1)

    def bn(y, g, be):
        m = jnp.mean(y, axis=(0, 2, 3), keepdims=True)
        v = jnp.mean((y - m) ** 2, axis=(0, 2, 3), keepdims=True)
        return (y - m) * jax.lax.rsqrt(v + _EPS) * g.reshape(1, -1, 1, 1) \
            + be.reshape(1, -1, 1, 1)

    y1 = jax.nn.relu(bn(conv(xb, params["w1"], params["b1"]),
                        params["g1"], params["be1"]))
    y1 = y1.astype(jnp.bfloat16).astype(f32)      # mirror the bf16 conv-operand policy
    y2 = bn(conv(y1, params["w2"], params["b2"]), params["g2"], params["be2"])
    return jax.nn.relu(y2 + x)                    # residual uses exact f32 x


if __name__ == "__main__":
    key = jax.random.PRNGKey(0)
    kx, kp = jax.random.split(key)
    N, C, H, W = 2, 4, 16, 16
    x = jax.random.normal(kx, (N, C, H, W), jnp.float32)
    params = init_params(kp, C)

    out = residual_block(x, params)
    jax.block_until_ready(out)

    ref = reference(x, params)
    assert out.shape == (N, C, H, W)
    # remaining differences are f32 reduction-order noise (~1e-6)
    np.testing.assert_allclose(np.asarray(out), np.asarray(ref),
                               atol=2e-4, rtol=2e-4)
    print("KERNEL_OK")
</pallas_src>

<mosaic_0001>
module attributes {stable_mosaic.version = 11 : i64} {
  func.func @conv1_stats_kernel(%arg0: i32, %arg1: memref<1x4x324xbf16, #tpu.memory_space<vmem>>, %arg2: memref<9x4x4xbf16, #tpu.memory_space<vmem>>, %arg3: memref<1x324xf32, #tpu.memory_space<vmem>>, %arg4: memref<1x4x324xf32, #tpu.memory_space<vmem>>, %arg5: memref<4x1xf32, #tpu.memory_space<vmem>>, %arg6: memref<4x1xf32, #tpu.memory_space<vmem>>) attributes {dimension_semantics = [#tpu.dimension_semantics<arbitrary>], iteration_bounds = array<i64: 2>, scalar_prefetch = 0 : i64, scratch_operands = 0 : i64, tpu.core_type = #tpu.core_type<tc>, window_params = [{transform_indices = @transform_0, window_bounds = array<i64: 1, 4, 324>}, {pipeline_mode = #tpu.pipeline_mode<synchronous>, transform_indices = @transform_1, window_bounds = array<i64: 9, 4, 4>}, {pipeline_mode = #tpu.pipeline_mode<synchronous>, transform_indices = @transform_2, window_bounds = array<i64: 1, 324>}, {transform_indices = @transform_3, window_bounds = array<i64: 1, 4, 324>}, {pipeline_mode = #tpu.pipeline_mode<synchronous>, transform_indices = @transform_4, window_bounds = array<i64: 4, 1>}, {pipeline_mode = #tpu.pipeline_mode<synchronous>, transform_indices = @transform_5, window_bounds = array<i64: 4, 1>}]} {
    %c0_i32 = arith.constant 0 : i32
    %0 = arith.cmpi eq, %arg0, %c0_i32 : i32
    %1 = arith.extui %0 : i1 to i32
    %c0_i32_0 = arith.constant 0 : i32
    %2 = arith.cmpi ne, %1, %c0_i32_0 : i32
    scf.if %2 {
      %cst_49 = arith.constant 0.000000e+00 : f32
      %82 = vector.broadcast %cst_49 : f32 to vector<4x1xf32>
      %c0_50 = arith.constant 0 : index
      %c0_51 = arith.constant 0 : index
      %83 = vector.load %arg5[%c0_50, %c0_51] : memref<4x1xf32, #tpu.memory_space<vmem>>, vector<4x1xf32>
      tpu.vector_store %arg5[%c0_50, %c0_51], %82 {strides = array<i32>} : memref<4x1xf32, #tpu.memory_space<vmem>>, vector<4x1xf32>,
      %cst_52 = arith.constant 0.000000e+00 : f32
      %84 = vector.broadcast %cst_52 : f32 to vector<4x1xf32>
      %c0_53 = arith.constant 0 : index
      %c0_54 = arith.constant 0 : index
      %85 = vector.load %arg6[%c0_53, %c0_54] : memref<4x1xf32, #tpu.memory_space<vmem>>, vector<4x1xf32>
      tpu.vector_store %arg6[%c0_53, %c0_54], %84 {strides = array<i32>} : memref<4x1xf32, #tpu.memory_space<vmem>>, vector<4x1xf32>,
    } else {
    }
    %c0 = arith.constant 0 : index
    %c0_1 = arith.constant 0 : index
    %c0_2 = arith.constant 0 : index
    %3 = vector.load %arg1[%c0, %c0_1, %c0_2] : memref<1x4x324xbf16, #tpu.memory_space<vmem>>, vector<1x4x324xbf16>
    %4 = vector.shape_cast %3 : vector<1x4x324xbf16> to vector<4x324xbf16>
    %5 = arith.extf %4 : vector<4x324xbf16> to vector<4x324xf32>
    %cst = arith.constant 0.000000e+00 : f32
    %6 = vector.broadcast %cst : f32 to vector<4x286xf32>
    %7 = vector.extract_strided_slice %5 {offsets = [0, 0], sizes = [4, 286], strides = [1, 1]} : vector<4x324xf32> to vector<4x286xf32>
    %c0_3 = arith.constant 0 : index
    %c0_4 = arith.constant 0 : index
    %c0_5 = arith.constant 0 : index
    %8 = vector.load %arg2[%c0_3, %c0_4, %c0_5] : memref<9x4x4xbf16, #tpu.memory_space<vmem>>, vector<1x4x4xbf16>
    %9 = vector.shape_cast %8 : vector<1x4x4xbf16> to vector<4x4xbf16>
    %10 = arith.extf %9 : vector<4x4xbf16> to vector<4x4xf32>
    %cst_6 = arith.constant dense<0.000000e+00> : vector<4x286xf32>
    %11 = tpu.matmul %10, %7, %cst_6 {dimension_numbers = #tpu.dot_dimension_numbers<[1], [0], [0], [1], [0, 0, 1, 1], [], []>} : vector<4x4xf32>, vector<4x286xf32>, vector<4x286xf32> -> vector<4x286xf32>
    %12 = arith.addf %6, %11 : vector<4x286xf32>
    %13 = vector.extract_strided_slice %5 {offsets = [0, 1], sizes = [4, 286], strides = [1, 1]} : vector<4x324xf32> to vector<4x286xf32>
    %c1 = arith.constant 1 : index
    %c0_7 = arith.constant 0 : index
    %c0_8 = arith.constant 0 : index
    %14 = vector.load %arg2[%c1, %c0_7, %c0_8] : memref<9x4x4xbf16, #tpu.memory_space<vmem>>, vector<1x4x4xbf16>
    %15 = vector.shape_cast %14 : vector<1x4x4xbf16> to vector<4x4xbf16>
    %16 = arith.extf %15 : vector<4x4xbf16> to vector<4x4xf32>
    %cst_9 = arith.constant dense<0.000000e+00> : vector<4x286xf32>
    %17 = tpu.matmul %16, %13, %cst_9 {dimension_numbers = #tpu.dot_dimension_numbers<[1], [0], [0], [1], [0, 0, 1, 1], [], []>} : vector<4x4xf32>, vector<4x286xf32>, vector<4x286xf32> -> vector<4x286xf32>
    %18 = arith.addf %12, %17 : vector<4x286xf32>
    %19 = vector.extract_strided_slice %5 {offsets = [0, 2], sizes = [4, 286], strides = [1, 1]} : vector<4x324xf32> to vector<4x286xf32>
    %c2 = arith.constant 2 : index
    %c0_10 = arith.constant 0 : index
    %c0_11 = arith.constant 0 : index
    %20 = vector.load %arg2[%c2, %c0_10, %c0_11] : memref<9x4x4xbf16, #tpu.memory_space<vmem>>, vector<1x4x4xbf16>
    %21 = vector.shape_cast %20 : vector<1x4x4xbf16> to vector<4x4xbf16>
    %22 = arith.extf %21 : vector<4x4xbf16> to vector<4x4xf32>
    %cst_12 = arith.constant dense<0.000000e+00> : vector<4x286xf32>
    %23 = tpu.matmul %22, %19, %cst_12 {dimension_numbers = #tpu.dot_dimension_numbers<[1], [0], [0], [1], [0, 0, 1, 1], [], []>} : vector<4x4xf32>, vector<4x286xf32>, vector<4x286xf32> -> vector<4x286xf32>
    %24 = arith.addf %18, %23 : vector<4x286xf32>
    %25 = vector.extract_strided_slice %5 {offsets = [0, 18], sizes = [4, 286], strides = [1, 1]} : vector<4x324xf32> to vector<4x286xf32>
    %c3 = arith.constant 3 : index
    %c0_13 = arith.constant 0 : index
    %c0_14 = arith.constant 0 : index
    %26 = vector.load %arg2[%c3, %c0_13, %c0_14] : memref<9x4x4xbf16, #tpu.memory_space<vmem>>, vector<1x4x4xbf16>
    %27 = vector.shape_cast %26 : vector<1x4x4xbf16> to vector<4x4xbf16>
    %28 = arith.extf %27 : vector<4x4xbf16> to vector<4x4xf32>
    %cst_15 = arith.constant dense<0.000000e+00> : vector<4x286xf32>
    %29 = tpu.matmul %28, %25, %cst_15 {dimension_numbers = #tpu.dot_dimension_numbers<[1], [0], [0], [1], [0, 0, 1, 1], [], []>} : vector<4x4xf32>, vector<4x286xf32>, vector<4x286xf32> -> vector<4x286xf32>
    %30 = arith.addf %24, %29 : vector<4x286xf32>
    %31 = vector.extract_strided_slice %5 {offsets = [0, 19], sizes = [4, 286], strides = [1, 1]} : vector<4x324xf32> to vector<4x286xf32>
    %c4 = arith.constant 4 : index
    %c0_16 = arith.constant 0 : index
    %c0_17 = arith.constant 0 : index
    %32 = vector.load %arg2[%c4, %c0_16, %c0_17] : memref<9x4x4xbf16, #tpu.memory_space<vmem>>, vector<1x4x4xbf16>
    %33 = vector.shape_cast %32 : vector<1x4x4xbf16> to vector<4x4xbf16>
    %34 = arith.extf %33 : vector<4x4xbf16> to vector<4x4xf32>
    %cst_18 = arith.constant dense<0.000000e+00> : vector<4x286xf32>
    %35 = tpu.matmul %34, %31, %cst_18 {dimension_numbers = #tpu.dot_dimension_numbers<[1], [0], [0], [1], [0, 0, 1, 1], [], []>} : vector<4x4xf32>, vector<4x286xf32>, vector<4x286xf32> -> vector<4x286xf32>
    %36 = arith.addf %30, %35 : vector<4x286xf32>
    %37 = vector.extract_strided_slice %5 {offsets = [0, 20], sizes = [4, 286], strides = [1, 1]} : vector<4x324xf32> to vector<4x286xf32>
    %c5 = arith.constant 5 : index
    %c0_19 = arith.constant 0 : index
    %c0_20 = arith.constant 0 : index
    %38 = vector.load %arg2[%c5, %c0_19, %c0_20] : memref<9x4x4xbf16, #tpu.memory_space<vmem>>, vector<1x4x4xbf16>
    %39 = vector.shape_cast %38 : vector<1x4x4xbf16> to vector<4x4xbf16>
    %40 = arith.extf %39 : vector<4x4xbf16> to vector<4x4xf32>
    %cst_21 = arith.constant dense<0.000000e+00> : vector<4x286xf32>
    %41 = tpu.matmul %40, %37, %cst_21 {dimension_numbers = #tpu.dot_dimension_numbers<[1], [0], [0], [1], [0, 0, 1, 1], [], []>} : vector<4x4xf32>, vector<4x286xf32>, vector<4x286xf32> -> vector<4x286xf32>
    %42 = arith.addf %36, %41 : vector<4x286xf32>
    %43 = vector.extract_strided_slice %5 {offsets = [0, 36], sizes = [4, 286], strides = [1, 1]} : vector<4x324xf32> to vector<4x286xf32>
    %c6 = arith.constant 6 : index
    %c0_22 = arith.constant 0 : index
    %c0_23 = arith.constant 0 : index
    %44 = vector.load %arg2[%c6, %c0_22, %c0_23] : memref<9x4x4xbf16, #tpu.memory_space<vmem>>, vector<1x4x4xbf16>
    %45 = vector.shape_cast %44 : vector<1x4x4xbf16> to vector<4x4xbf16>
    %46 = arith.extf %45 : vector<4x4xbf16> to vector<4x4xf32>
    %cst_24 = arith.constant dense<0.000000e+00> : vector<4x286xf32>
    %47 = tpu.matmul %46, %43, %cst_24 {dimension_numbers = #tpu.dot_dimension_numbers<[1], [0], [0], [1], [0, 0, 1, 1], [], []>} : vector<4x4xf32>, vector<4x286xf32>, vector<4x286xf32> -> vector<4x286xf32>
    %48 = arith.addf %42, %47 : vector<4x286xf32>
    %49 = vector.extract_strided_slice %5 {offsets = [0, 37], sizes = [4, 286], strides = [1, 1]} : vector<4x324xf32> to vector<4x286xf32>
    %c7 = arith.constant 7 : index
    %c0_25 = arith.constant 0 : index
    %c0_26 = arith.constant 0 : index
    %50 = vector.load %arg2[%c7, %c0_25, %c0_26] : memref<9x4x4xbf16, #tpu.memory_space<vmem>>, vector<1x4x4xbf16>
    %51 = vector.shape_cast %50 : vector<1x4x4xbf16> to vector<4x4xbf16>
    %52 = arith.extf %51 : vector<4x4xbf16> to vector<4x4xf32>
    %cst_27 = arith.constant dense<0.000000e+00> : vector<4x286xf32>
    %53 = tpu.matmul %52, %49, %cst_27 {dimension_numbers = #tpu.dot_dimension_numbers<[1], [0], [0], [1], [0, 0, 1, 1], [], []>} : vector<4x4xf32>, vector<4x286xf32>, vector<4x286xf32> -> vector<4x286xf32>
    %54 = arith.addf %48, %53 : vector<4x286xf32>
    %55 = vector.extract_strided_slice %5 {offsets = [0, 38], sizes = [4, 286], strides = [1, 1]} : vector<4x324xf32> to vector<4x286xf32>
    %c8 = arith.constant 8 : index
    %c0_28 = arith.constant 0 : index
    %c0_29 = arith.constant 0 : index
    %56 = vector.load %arg2[%c8, %c0_28, %c0_29] : memref<9x4x4xbf16, #tpu.memory_space<vmem>>, vector<1x4x4xbf16>
    %57 = vector.shape_cast %56 : vector<1x4x4xbf16> to vector<4x4xbf16>
    %58 = arith.extf %57 : vector<4x4xbf16> to vector<4x4xf32>
    %cst_30 = arith.constant dense<0.000000e+00> : vector<4x286xf32>
    %59 = tpu.matmul %58, %55, %cst_30 {dimension_numbers = #tpu.dot_dimension_numbers<[1], [0], [0], [1], [0, 0, 1, 1], [], []>} : vector<4x4xf32>, vector<4x286xf32>, vector<4x286xf32> -> vector<4x286xf32>
    %60 = arith.addf %54, %59 : vector<4x286xf32>
    %cst_31 = arith.constant 0.000000e+00 : f32
    %61 = vector.broadcast %cst_31 : f32 to vector<4x324xf32>
    %c0_32 = arith.constant 0 : index
    %c0_33 = arith.constant 0 : index
    %c0_34 = arith.constant 0 : index
    %62 = vector.load %arg4[%c0_32, %c0_33, %c0_34] : memref<1x4x324xf32, #tpu.memory_space<vmem>>, vector<1x4x324xf32>
    %63 = vector.shape_cast %62 : vector<1x4x324xf32> to vector<4x324xf32>
    %64 = vector.shape_cast %61 : vector<4x324xf32> to vector<1x4x324xf32>
    tpu.vector_store %arg4[%c0_32, %c0_33, %c0_34], %64 {strides = array<i32>} : memref<1x4x324xf32, #tpu.memory_space<vmem>>, vector<1x4x324xf32>,
    %c0_35 = arith.constant 0 : index
    %c0_36 = arith.constant 0 : index
    %c19 = arith.constant 19 : index
    %65 = vector.load %arg4[%c0_35, %c0_36, %c19] : memref<1x4x324xf32, #tpu.memory_space<vmem>>, vector<1x4x286xf32>
    %66 = vector.shape_cast %65 : vector<1x4x286xf32> to vector<4x286xf32>
    %67 = vector.shape_cast %60 : vector<4x286xf32> to vector<1x4x286xf32>
    tpu.vector_store %arg4[%c0_35, %c0_36, %c19], %67 {strides = array<i32>} : memref<1x4x324xf32, #tpu.memory_space<vmem>>, vector<1x4x286xf32>,
    %c0_37 = arith.constant 0 : index
    %c19_38 = arith.constant 19 : index
    %68 = vector.load %arg3[%c0_37, %c19_38] : memref<1x324xf32, #tpu.memory_space<vmem>>, vector<1x286xf32>
    %69 = vector.broadcast %68 : vector<1x286xf32> to vector<4x286xf32>
    %70 = arith.mulf %60, %69 : vector<4x286xf32>
    %c0_39 = arith.constant 0 : index
    %c0_40 = arith.constant 0 : index
    %71 = vector.load %arg5[%c0_39, %c0_40] : memref<4x1xf32, #tpu.memory_space<vmem>>, vector<4x1xf32>
    %cst_41 = arith.constant dense<0.000000e+00> : vector<4xf32>
    %72 = vector.multi_reduction <add>, %70, %cst_41 [1] : vector<4x286xf32> to vector<4xf32>
    %73 = vector.shape_cast %72 : vector<4xf32> to vector<4x1xf32>
    %74 = arith.addf %71, %73 : vector<4x1xf32>
    %c0_42 = arith.constant 0 : index
    %c0_43 = arith.constant 0 : index
    %75 = vector.load %arg5[%c0_42, %c0_43] : memref<4x1xf32, #tpu.memory_space<vmem>>, vector<4x1xf32>
    tpu.vector_store %arg5[%c0_42, %c0_43], %74 {strides = array<i32>} : memref<4x1xf32, #tpu.memory_space<vmem>>, vector<4x1xf32>,
    %c0_44 = arith.constant 0 : index
    %c0_45 = arith.constant 0 : index
    %76 = vector.load %arg6[%c0_44, %c0_45] : memref<4x1xf32, #tpu.memory_space<vmem>>, vector<4x1xf32>
    %77 = arith.mulf %70, %60 : vector<4x286xf32>
    %cst_46 = arith.constant dense<0.000000e+00> : vector<4xf32>
    %78 = vector.multi_reduction <add>, %77, %cst_46 [1] : vector<4x286xf32> to vector<4xf32>
    %79 = vector.shape_cast %78 : vector<4xf32> to vector<4x1xf32>
    %80 = arith.addf %76, %79 : vector<4x1xf32>
    %c0_47 = arith.constant 0 : index
    %c0_48 = arith.constant 0 : index
    %81 = vector.load %arg6[%c0_47, %c0_48] : memref<4x1xf32, #tpu.memory_space<vmem>>, vector<4x1xf32>
    tpu.vector_store %arg6[%c0_47, %c0_48], %80 {strides = array<i32>} : memref<4x1xf32, #tpu.memory_space<vmem>>, vector<4x1xf32>,
    return
  }
  func.func @transform_0(%arg0: i32) -> (i32, i32, i32) {
    %c0_i32 = arith.constant 0 : i32
    %c0_i32_0 = arith.constant 0 : i32
    %c0_i32_1 = arith.constant 0 : i32
    return %arg0, %c0_i32, %c0_i32_0 : i32, i32, i32
  }
  func.func @transform_1(%arg0: i32) -> (i32, i32, i32) {
    %c0_i32 = arith.constant 0 : i32
    %c0_i32_0 = arith.constant 0 : i32
    %c0_i32_1 = arith.constant 0 : i32
    %c0_i32_2 = arith.constant 0 : i32
    return %c0_i32, %c0_i32_0, %c0_i32_1 : i32, i32, i32
  }
  func.func @transform_2(%arg0: i32) -> (i32, i32) {
    %c0_i32 = arith.constant 0 : i32
    %c0_i32_0 = arith.constant 0 : i32
    %c0_i32_1 = arith.constant 0 : i32
    return %c0_i32, %c0_i32_0 : i32, i32
  }
  func.func @transform_3(%arg0: i32) -> (i32, i32, i32) {
    %c0_i32 = arith.constant 0 : i32
    %c0_i32_0 = arith.constant 0 : i32
    %c0_i32_1 = arith.constant 0 : i32
    return %arg0, %c0_i32, %c0_i32_0 : i32, i32, i32
  }
  func.func @transform_4(%arg0: i32) -> (i32, i32) {
    %c0_i32 = arith.constant 0 : i32
    %c0_i32_0 = arith.constant 0 : i32
    %c0_i32_1 = arith.constant 0 : i32
    return %c0_i32, %c0_i32_0 : i32, i32
  }
  func.func @transform_5(%arg0: i32) -> (i32, i32) {
    %c0_i32 = arith.constant 0 : i32
    %c0_i32_0 = arith.constant 0 : i32
    %c0_i32_1 = arith.constant 0 : i32
    return %c0_i32, %c0_i32_0 : i32, i32
  }
}

module attributes {stable_mosaic.version = 11 : i64} {
  func.func @bn2_add_relu_kernel(%arg0: i32, %arg1: memref<1x4x286xf32, #tpu.memory_space<vmem>>, %arg2: memref<4x1xf32, #tpu.memory_space<vmem>>, %arg3: memref<4x1xf32, #tpu.memory_space<vmem>>, %arg4: memref<1x4x324xf32, #tpu.memory_space<vmem>>, %arg5: memref<1x4x286xf32, #tpu.memory_space<vmem>>) attributes {dimension_semantics = [#tpu.dimension_semantics<parallel>], iteration_bounds = array<i64: 2>, scalar_prefetch = 0 : i64, scratch_operands = 0 : i64, tpu.core_type = #tpu.core_type<tc>, window_params = [{transform_indices = @transform_0, window_bounds = array<i64: 1, 4, 286>}, {pipeline_mode = #tpu.pipeline_mode<synchronous>, transform_indices = @transform_1, window_bounds = array<i64: 4, 1>}, {pipeline_mode = #tpu.pipeline_mode<synchronous>, transform_indices = @transform_2, window_bounds = array<i64: 4, 1>}, {transform_indices = @transform_3, window_bounds = array<i64: 1, 4, 324>}, {transform_indices = @transform_4, window_bounds = array<i64: 1, 4, 286>}]} {
    %c0 = arith.constant 0 : index
    %c0_0 = arith.constant 0 : index
    %c0_1 = arith.constant 0 : index
    %0 = vector.load %arg1[%c0, %c0_0, %c0_1] : memref<1x4x286xf32, #tpu.memory_space<vmem>>, vector<1x4x286xf32>
    %1 = vector.shape_cast %0 : vector<1x4x286xf32> to vector<4x286xf32>
    %c0_2 = arith.constant 0 : index
    %c0_3 = arith.constant 0 : index
    %c0_4 = arith.constant 0 : index
    %2 = vector.load %arg4[%c0_2, %c0_3, %c0_4] : memref<1x4x324xf32, #tpu.memory_space<vmem>>, vector<1x4x324xf32>
    %3 = vector.shape_cast %2 : vector<1x4x324xf32> to vector<4x324xf32>
    %4 = vector.extract_strided_slice %3 {offsets = [0, 19], sizes = [4, 286], strides = [1, 1]} : vector<4x324xf32> to vector<4x286xf32>
    %c0_5 = arith.constant 0 : index
    %c0_6 = arith.constant 0 : index
    %5 = vector.load %arg2[%c0_5, %c0_6] : memref<4x1xf32, #tpu.memory_space<vmem>>, vector<4x1xf32>
    %6 = vector.broadcast %5 : vector<4x1xf32> to vector<4x286xf32>
    %7 = arith.mulf %1, %6 : vector<4x286xf32>
    %c0_7 = arith.constant 0 : index
    %c0_8 = arith.constant 0 : index
    %8 = vector.load %arg3[%c0_7, %c0_8] : memref<4x1xf32, #tpu.memory_space<vmem>>, vector<4x1xf32>
    %9 = vector.broadcast %8 : vector<4x1xf32> to vector<4x286xf32>
    %10 = arith.addf %7, %9 : vector<4x286xf32>
    %11 = arith.addf %10, %4 : vector<4x286xf32>
    %cst = arith.constant 0.000000e+00 : f32
    %12 = vector.broadcast %cst : f32 to vector<4x286xf32>
    %13 = arith.maximumf %11, %12 : vector<4x286xf32>
    %c0_9 = arith.constant 0 : index
    %c0_10 = arith.constant 0 : index
    %c0_11 = arith.constant 0 : index
    %14 = vector.load %arg5[%c0_9, %c0_10, %c0_11] : memref<1x4x286xf32, #tpu.memory_space<vmem>>, vector<1x4x286xf32>
    %15 = vector.shape_cast %14 : vector<1x4x286xf32> to vector<4x286xf32>
    %16 = vector.shape_cast %13 : vector<4x286xf32> to vector<1x4x286xf32>
    tpu.vector_store %arg5[%c0_9, %c0_10, %c0_11], %16 {strides = array<i32>} : memref<1x4x286xf32, #tpu.memory_space<vmem>>, vector<1x4x286xf32>,
    return
  }
  func.func @transform_0(%arg0: i32) -> (i32, i32, i32) {
    %c0_i32 = arith.constant 0 : i32
    %c0_i32_0 = arith.constant 0 : i32
    %c0_i32_1 = arith.constant 0 : i32
    return %arg0, %c0_i32, %c0_i32_0 : i32, i32, i32
  }
  func.func @transform_1(%arg0: i32) -> (i32, i32) {
    %c0_i32 = arith.constant 0 : i32
    %c0_i32_0 = arith.constant 0 : i32
    %c0_i32_1 = arith.constant 0 : i32
    return %c0_i32, %c0_i32_0 : i32, i32
  }
  func.func @transform_2(%arg0: i32) -> (i32, i32) {
    %c0_i32 = arith.constant 0 : i32
    %c0_i32_0 = arith.constant 0 : i32
    %c0_i32_1 = arith.constant 0 : i32
    return %c0_i32, %c0_i32_0 : i32, i32
  }
  func.func @transform_3(%arg0: i32) -> (i32, i32, i32) {
    %c0_i32 = arith.constant 0 : i32
    %c0_i32_0 = arith.constant 0 : i32
    %c0_i32_1 = arith.constant 0 : i32
    return %arg0, %c0_i32, %c0_i32_0 : i32, i32, i32
  }
  func.func @transform_4(%arg0: i32) -> (i32, i32, i32) {
    %c0_i32 = arith.constant 0 : i32
    %c0_i32_0 = arith.constant 0 : i32
    %c0_i32_1 = arith.constant 0 : i32
    return %arg0, %c0_i32, %c0_i32_0 : i32, i32, i32
  }
}

module attributes {stable_mosaic.version = 11 : i64} {
  func.func @bn1_relu_conv2_stats_kernel(%arg0: i32, %arg1: memref<1x4x324xf32, #tpu.memory_space<vmem>>, %arg2: memref<4x1xf32, #tpu.memory_space<vmem>>, %arg3: memref<4x1xf32, #tpu.memory_space<vmem>>, %arg4: memref<9x4x4xbf16, #tpu.memory_space<vmem>>, %arg5: memref<1x324xf32, #tpu.memory_space<vmem>>, %arg6: memref<1x4x286xf32, #tpu.memory_space<vmem>>, %arg7: memref<4x1xf32, #tpu.memory_space<vmem>>, %arg8: memref<4x1xf32, #tpu.memory_space<vmem>>) attributes {dimension_semantics = [#tpu.dimension_semantics<arbitrary>], iteration_bounds = array<i64: 2>, scalar_prefetch = 0 : i64, scratch_operands = 0 : i64, tpu.core_type = #tpu.core_type<tc>, window_params = [{transform_indices = @transform_0, window_bounds = array<i64: 1, 4, 324>}, {pipeline_mode = #tpu.pipeline_mode<synchronous>, transform_indices = @transform_1, window_bounds = array<i64: 4, 1>}, {pipeline_mode = #tpu.pipeline_mode<synchronous>, transform_indices = @transform_2, window_bounds = array<i64: 4, 1>}, {pipeline_mode = #tpu.pipeline_mode<synchronous>, transform_indices = @transform_3, window_bounds = array<i64: 9, 4, 4>}, {pipeline_mode = #tpu.pipeline_mode<synchronous>, transform_indices = @transform_4, window_bounds = array<i64: 1, 324>}, {transform_indices = @transform_5, window_bounds = array<i64: 1, 4, 286>}, {pipeline_mode = #tpu.pipeline_mode<synchronous>, transform_indices = @transform_6, window_bounds = array<i64: 4, 1>}, {pipeline_mode = #tpu.pipeline_mode<synchronous>, transform_indices = @transform_7, window_bounds = array<i64: 4, 1>}]} {
    %c0_i32 = arith.constant 0 : i32
    %0 = arith.cmpi eq, %arg0, %c0_i32 : i32
    %1 = arith.extui %0 : i1 to i32
    %c0_i32_0 = arith.constant 0 : i32
    %2 = arith.cmpi ne, %1, %c0_i32_0 : i32
    scf.if %2 {
      %cst_52 = arith.constant 0.000000e+00 : f32
      %90 = vector.broadcast %cst_52 : f32 to vector<4x1xf32>
      %c0_53 = arith.constant 0 : index
      %c0_54 = arith.constant 0 : index
      %91 = vector.load %arg7[%c0_53, %c0_54] : memref<4x1xf32, #tpu.memory_space<vmem>>, vector<4x1xf32>
      tpu.vector_store %arg7[%c0_53, %c0_54], %90 {strides = array<i32>} : memref<4x1xf32, #tpu.memory_space<vmem>>, vector<4x1xf32>,
      %cst_55 = arith.constant 0.000000e+00 : f32
      %92 = vector.broadcast %cst_55 : f32 to vector<4x1xf32>
      %c0_56 = arith.constant 0 : index
      %c0_57 = arith.constant 0 : index
      %93 = vector.load %arg8[%c0_56, %c0_57] : memref<4x1xf32, #tpu.memory_space<vmem>>, vector<4x1xf32>
      tpu.vector_store %arg8[%c0_56, %c0_57], %92 {strides = array<i32>} : memref<4x1xf32, #tpu.memory_space<vmem>>, vector<4x1xf32>,
    } else {
    }
    %c0 = arith.constant 0 : index
    %c0_1 = arith.constant 0 : index
    %c0_2 = arith.constant 0 : index
    %3 = vector.load %arg1[%c0, %c0_1, %c0_2] : memref<1x4x324xf32, #tpu.memory_space<vmem>>, vector<1x4x324xf32>
    %4 = vector.shape_cast %3 : vector<1x4x324xf32> to vector<4x324xf32>
    %c0_3 = arith.constant 0 : index
    %c0_4 = arith.constant 0 : index
    %5 = vector.load %arg2[%c0_3, %c0_4] : memref<4x1xf32, #tpu.memory_space<vmem>>, vector<4x1xf32>
    %6 = vector.broadcast %5 : vector<4x1xf32> to vector<4x324xf32>
    %7 = arith.mulf %4, %6 : vector<4x324xf32>
    %c0_5 = arith.constant 0 : index
    %c0_6 = arith.constant 0 : index
    %8 = vector.load %arg3[%c0_5, %c0_6] : memref<4x1xf32, #tpu.memory_space<vmem>>, vector<4x1xf32>
    %9 = vector.broadcast %8 : vector<4x1xf32> to vector<4x324xf32>
    %10 = arith.addf %7, %9 : vector<4x324xf32>
    %cst = arith.constant 0.000000e+00 : f32
    %11 = vector.broadcast %cst : f32 to vector<4x324xf32>
    %12 = arith.maximumf %10, %11 : vector<4x324xf32>
    %c0_7 = arith.constant 0 : index
    %c0_8 = arith.constant 0 : index
    %13 = vector.load %arg5[%c0_7, %c0_8] : memref<1x324xf32, #tpu.memory_space<vmem>>, vector<1x324xf32>
    %14 = vector.broadcast %13 : vector<1x324xf32> to vector<4x324xf32>
    %15 = arith.mulf %12, %14 : vector<4x324xf32>
    %16 = arith.truncf %15 : vector<4x324xf32> to vector<4x324xbf16>
    %17 = arith.extf %16 : vector<4x324xbf16> to vector<4x324xf32>
    %cst_9 = arith.constant 0.000000e+00 : f32
    %18 = vector.broadcast %cst_9 : f32 to vector<4x286xf32>
    %19 = vector.extract_strided_slice %17 {offsets = [0, 0], sizes = [4, 286], strides = [1, 1]} : vector<4x324xf32> to vector<4x286xf32>
    %c0_10 = arith.constant 0 : index
    %c0_11 = arith.constant 0 : index
    %c0_12 = arith.constant 0 : index
    %20 = vector.load %arg4[%c0_10, %c0_11, %c0_12] : memref<9x4x4xbf16, #tpu.memory_space<vmem>>, vector<1x4x4xbf16>
    %21 = vector.shape_cast %20 : vector<1x4x4xbf16> to vector<4x4xbf16>
    %22 = arith.extf %21 : vector<4x4xbf16> to vector<4x4xf32>
    %cst_13 = arith.constant dense<0.000000e+00> : vector<4x286xf32>
    %23 = tpu.matmul %22, %19, %cst_13 {dimension_numbers = #tpu.dot_dimension_numbers<[1], [0], [0], [1], [0, 0, 1, 1], [], []>} : vector<4x4xf32>, vector<4x286xf32>, vector<4x286xf32> -> vector<4x286xf32>
    %24 = arith.addf %18, %23 : vector<4x286xf32>
    %25 = vector.extract_strided_slice %17 {offsets = [0, 1], sizes = [4, 286], strides = [1, 1]} : vector<4x324xf32> to vector<4x286xf32>
    %c1 = arith.constant 1 : index
    %c0_14 = arith.constant 0 : index
    %c0_15 = arith.constant 0 : index
    %26 = vector.load %arg4[%c1, %c0_14, %c0_15] : memref<9x4x4xbf16, #tpu.memory_space<vmem>>, vector<1x4x4xbf16>
    %27 = vector.shape_cast %26 : vector<1x4x4xbf16> to vector<4x4xbf16>
    %28 = arith.extf %27 : vector<4x4xbf16> to vector<4x4xf32>
    %cst_16 = arith.constant dense<0.000000e+00> : vector<4x286xf32>
    %29 = tpu.matmul %28, %25, %cst_16 {dimension_numbers = #tpu.dot_dimension_numbers<[1], [0], [0], [1], [0, 0, 1, 1], [], []>} : vector<4x4xf32>, vector<4x286xf32>, vector<4x286xf32> -> vector<4x286xf32>
    %30 = arith.addf %24, %29 : vector<4x286xf32>
    %31 = vector.extract_strided_slice %17 {offsets = [0, 2], sizes = [4, 286], strides = [1, 1]} : vector<4x324xf32> to vector<4x286xf32>
    %c2 = arith.constant 2 : index
    %c0_17 = arith.constant 0 : index
    %c0_18 = arith.constant 0 : index
    %32 = vector.load %arg4[%c2, %c0_17, %c0_18] : memref<9x4x4xbf16, #tpu.memory_space<vmem>>, vector<1x4x4xbf16>
    %33 = vector.shape_cast %32 : vector<1x4x4xbf16> to vector<4x4xbf16>
    %34 = arith.extf %33 : vector<4x4xbf16> to vector<4x4xf32>
    %cst_19 = arith.constant dense<0.000000e+00> : vector<4x286xf32>
    %35 = tpu.matmul %34, %31, %cst_19 {dimension_numbers = #tpu.dot_dimension_numbers<[1], [0], [0], [1], [0, 0, 1, 1], [], []>} : vector<4x4xf32>, vector<4x286xf32>, vector<4x286xf32> -> vector<4x286xf32>
    %36 = arith.addf %30, %35 : vector<4x286xf32>
    %37 = vector.extract_strided_slice %17 {offsets = [0, 18], sizes = [4, 286], strides = [1, 1]} : vector<4x324xf32> to vector<4x286xf32>
    %c3 = arith.constant 3 : index
    %c0_20 = arith.constant 0 : index
    %c0_21 = arith.constant 0 : index
    %38 = vector.load %arg4[%c3, %c0_20, %c0_21] : memref<9x4x4xbf16, #tpu.memory_space<vmem>>, vector<1x4x4xbf16>
    %39 = vector.shape_cast %38 : vector<1x4x4xbf16> to vector<4x4xbf16>
    %40 = arith.extf %39 : vector<4x4xbf16> to vector<4x4xf32>
    %cst_22 = arith.constant dense<0.000000e+00> : vector<4x286xf32>
    %41 = tpu.matmul %40, %37, %cst_22 {dimension_numbers = #tpu.dot_dimension_numbers<[1], [0], [0], [1], [0, 0, 1, 1], [], []>} : vector<4x4xf32>, vector<4x286xf32>, vector<4x286xf32> -> vector<4x286xf32>
    %42 = arith.addf %36, %41 : vector<4x286xf32>
    %43 = vector.extract_strided_slice %17 {offsets = [0, 19], sizes = [4, 286], strides = [1, 1]} : vector<4x324xf32> to vector<4x286xf32>
    %c4 = arith.constant 4 : index
    %c0_23 = arith.constant 0 : index
    %c0_24 = arith.constant 0 : index
    %44 = vector.load %arg4[%c4, %c0_23, %c0_24] : memref<9x4x4xbf16, #tpu.memory_space<vmem>>, vector<1x4x4xbf16>
    %45 = vector.shape_cast %44 : vector<1x4x4xbf16> to vector<4x4xbf16>
    %46 = arith.extf %45 : vector<4x4xbf16> to vector<4x4xf32>
    %cst_25 = arith.constant dense<0.000000e+00> : vector<4x286xf32>
    %47 = tpu.matmul %46, %43, %cst_25 {dimension_numbers = #tpu.dot_dimension_numbers<[1], [0], [0], [1], [0, 0, 1, 1], [], []>} : vector<4x4xf32>, vector<4x286xf32>, vector<4x286xf32> -> vector<4x286xf32>
    %48 = arith.addf %42, %47 : vector<4x286xf32>
    %49 = vector.extract_strided_slice %17 {offsets = [0, 20], sizes = [4, 286], strides = [1, 1]} : vector<4x324xf32> to vector<4x286xf32>
    %c5 = arith.constant 5 : index
    %c0_26 = arith.constant 0 : index
    %c0_27 = arith.constant 0 : index
    %50 = vector.load %arg4[%c5, %c0_26, %c0_27] : memref<9x4x4xbf16, #tpu.memory_space<vmem>>, vector<1x4x4xbf16>
    %51 = vector.shape_cast %50 : vector<1x4x4xbf16> to vector<4x4xbf16>
    %52 = arith.extf %51 : vector<4x4xbf16> to vector<4x4xf32>
    %cst_28 = arith.constant dense<0.000000e+00> : vector<4x286xf32>
    %53 = tpu.matmul %52, %49, %cst_28 {dimension_numbers = #tpu.dot_dimension_numbers<[1], [0], [0], [1], [0, 0, 1, 1], [], []>} : vector<4x4xf32>, vector<4x286xf32>, vector<4x286xf32> -> vector<4x286xf32>
    %54 = arith.addf %48, %53 : vector<4x286xf32>
    %55 = vector.extract_strided_slice %17 {offsets = [0, 36], sizes = [4, 286], strides = [1, 1]} : vector<4x324xf32> to vector<4x286xf32>
    %c6 = arith.constant 6 : index
    %c0_29 = arith.constant 0 : index
    %c0_30 = arith.constant 0 : index
    %56 = vector.load %arg4[%c6, %c0_29, %c0_30] : memref<9x4x4xbf16, #tpu.memory_space<vmem>>, vector<1x4x4xbf16>
    %57 = vector.shape_cast %56 : vector<1x4x4xbf16> to vector<4x4xbf16>
    %58 = arith.extf %57 : vector<4x4xbf16> to vector<4x4xf32>
    %cst_31 = arith.constant dense<0.000000e+00> : vector<4x286xf32>
    %59 = tpu.matmul %58, %55, %cst_31 {dimension_numbers = #tpu.dot_dimension_numbers<[1], [0], [0], [1], [0, 0, 1, 1], [], []>} : vector<4x4xf32>, vector<4x286xf32>, vector<4x286xf32> -> vector<4x286xf32>
    %60 = arith.addf %54, %59 : vector<4x286xf32>
    %61 = vector.extract_strided_slice %17 {offsets = [0, 37], sizes = [4, 286], strides = [1, 1]} : vector<4x324xf32> to vector<4x286xf32>
    %c7 = arith.constant 7 : index
    %c0_32 = arith.constant 0 : index
    %c0_33 = arith.constant 0 : index
    %62 = vector.load %arg4[%c7, %c0_32, %c0_33] : memref<9x4x4xbf16, #tpu.memory_space<vmem>>, vector<1x4x4xbf16>
    %63 = vector.shape_cast %62 : vector<1x4x4xbf16> to vector<4x4xbf16>
    %64 = arith.extf %63 : vector<4x4xbf16> to vector<4x4xf32>
    %cst_34 = arith.constant dense<0.000000e+00> : vector<4x286xf32>
    %65 = tpu.matmul %64, %61, %cst_34 {dimension_numbers = #tpu.dot_dimension_numbers<[1], [0], [0], [1], [0, 0, 1, 1], [], []>} : vector<4x4xf32>, vector<4x286xf32>, vector<4x286xf32> -> vector<4x286xf32>
    %66 = arith.addf %60, %65 : vector<4x286xf32>
    %67 = vector.extract_strided_slice %17 {offsets = [0, 38], sizes = [4, 286], strides = [1, 1]} : vector<4x324xf32> to vector<4x286xf32>
    %c8 = arith.constant 8 : index
    %c0_35 = arith.constant 0 : index
    %c0_36 = arith.constant 0 : index
    %68 = vector.load %arg4[%c8, %c0_35, %c0_36] : memref<9x4x4xbf16, #tpu.memory_space<vmem>>, vector<1x4x4xbf16>
    %69 = vector.shape_cast %68 : vector<1x4x4xbf16> to vector<4x4xbf16>
    %70 = arith.extf %69 : vector<4x4xbf16> to vector<4x4xf32>
    %cst_37 = arith.constant dense<0.000000e+00> : vector<4x286xf32>
    %71 = tpu.matmul %70, %67, %cst_37 {dimension_numbers = #tpu.dot_dimension_numbers<[1], [0], [0], [1], [0, 0, 1, 1], [], []>} : vector<4x4xf32>, vector<4x286xf32>, vector<4x286xf32> -> vector<4x286xf32>
    %72 = arith.addf %66, %71 : vector<4x286xf32>
    %c0_38 = arith.constant 0 : index
    %c0_39 = arith.constant 0 : index
    %c0_40 = arith.constant 0 : index
    %73 = vector.load %arg6[%c0_38, %c0_39, %c0_40] : memref<1x4x286xf32, #tpu.memory_space<vmem>>, vector<1x4x286xf32>
    %74 = vector.shape_cast %73 : vector<1x4x286xf32> to vector<4x286xf32>
    %75 = vector.shape_cast %72 : vector<4x286xf32> to vector<1x4x286xf32>
    tpu.vector_store %arg6[%c0_38, %c0_39, %c0_40], %75 {strides = array<i32>} : memref<1x4x286xf32, #tpu.memory_space<vmem>>, vector<1x4x286xf32>,
    %c0_41 = arith.constant 0 : index
    %c19 = arith.constant 19 : index
    %76 = vector.load %arg5[%c0_41, %c19] : memref<1x324xf32, #tpu.memory_space<vmem>>, vector<1x286xf32>
    %77 = vector.broadcast %76 : vector<1x286xf32> to vector<4x286xf32>
    %78 = arith.mulf %72, %77 : vector<4x286xf32>
    %c0_42 = arith.constant 0 : index
    %c0_43 = arith.constant 0 : index
    %79 = vector.load %arg7[%c0_42, %c0_43] : memref<4x1xf32, #tpu.memory_space<vmem>>, vector<4x1xf32>
    %cst_44 = arith.constant dense<0.000000e+00> : vector<4xf32>
    %80 = vector.multi_reduction <add>, %78, %cst_44 [1] : vector<4x286xf32> to vector<4xf32>
    %81 = vector.shape_cast %80 : vector<4xf32> to vector<4x1xf32>
    %82 = arith.addf %79, %81 : vector<4x1xf32>
    %c0_45 = arith.constant 0 : index
    %c0_46 = arith.constant 0 : index
    %83 = vector.load %arg7[%c0_45, %c0_46] : memref<4x1xf32, #tpu.memory_space<vmem>>, vector<4x1xf32>
    tpu.vector_store %arg7[%c0_45, %c0_46], %82 {strides = array<i32>} : memref<4x1xf32, #tpu.memory_space<vmem>>, vector<4x1xf32>,
    %c0_47 = arith.constant 0 : index
    %c0_48 = arith.constant 0 : index
    %84 = vector.load %arg8[%c0_47, %c0_48] : memref<4x1xf32, #tpu.memory_space<vmem>>, vector<4x1xf32>
    %85 = arith.mulf %78, %72 : vector<4x286xf32>
    %cst_49 = arith.constant dense<0.000000e+00> : vector<4xf32>
    %86 = vector.multi_reduction <add>, %85, %cst_49 [1] : vector<4x286xf32> to vector<4xf32>
    %87 = vector.shape_cast %86 : vector<4xf32> to vector<4x1xf32>
    %88 = arith.addf %84, %87 : vector<4x1xf32>
    %c0_50 = arith.constant 0 : index
    %c0_51 = arith.constant 0 : index
    %89 = vector.load %arg8[%c0_50, %c0_51] : memref<4x1xf32, #tpu.memory_space<vmem>>, vector<4x1xf32>
    tpu.vector_store %arg8[%c0_50, %c0_51], %88 {strides = array<i32>} : memref<4x1xf32, #tpu.memory_space<vmem>>, vector<4x1xf32>,
    return
  }
  func.func @transform_0(%arg0: i32) -> (i32, i32, i32) {
    %c0_i32 = arith.constant 0 : i32
    %c0_i32_0 = arith.constant 0 : i32
    %c0_i32_1 = arith.constant 0 : i32
    return %arg0, %c0_i32, %c0_i32_0 : i32, i32, i32
  }
  func.func @transform_1(%arg0: i32) -> (i32, i32) {
    %c0_i32 = arith.constant 0 : i32
    %c0_i32_0 = arith.constant 0 : i32
    %c0_i32_1 = arith.constant 0 : i32
    return %c0_i32, %c0_i32_0 : i32, i32
  }
  func.func @transform_2(%arg0: i32) -> (i32, i32) {
    %c0_i32 = arith.constant 0 : i32
    %c0_i32_0 = arith.constant 0 : i32
    %c0_i32_1 = arith.constant 0 : i32
    return %c0_i32, %c0_i32_0 : i32, i32
  }
  func.func @transform_3(%arg0: i32) -> (i32, i32, i32) {
    %c0_i32 = arith.constant 0 : i32
    %c0_i32_0 = arith.constant 0 : i32
    %c0_i32_1 = arith.constant 0 : i32
    %c0_i32_2 = arith.constant 0 : i32
    return %c0_i32, %c0_i32_0, %c0_i32_1 : i32, i32, i32
  }
  func.func @transform_4(%arg0: i32) -> (i32, i32) {
    %c0_i32 = arith.constant 0 : i32
    %c0_i32_0 = arith.constant 0 : i32
    %c0_i32_1 = arith.constant 0 : i32
    return %c0_i32, %c0_i32_0 : i32, i32
  }
  func.func @transform_5(%arg0: i32) -> (i32, i32, i32) {
    %c0_i32 = arith.constant 0 : i32
    %c0_i32_0 = arith.constant 0 : i32
    %c0_i32_1 = arith.constant 0 : i32
    return %arg0, %c0_i32, %c0_i32_0 : i32, i32, i32
  }
  func.func @transform_6(%arg0: i32) -> (i32, i32) {
    %c0_i32 = arith.constant 0 : i32
    %c0_i32_0 = arith.constant 0 : i32
    %c0_i32_1 = arith.constant 0 : i32
    return %c0_i32, %c0_i32_0 : i32, i32
  }
  func.func @transform_7(%arg0: i32) -> (i32, i32) {
    %c0_i32 = arith.constant 0 : i32
    %c0_i32_0 = arith.constant 0 : i32
    %c0_i32_1 = arith.constant 0 : i32
    return %c0_i32, %c0_i32_0 : i32, i32
  }
}

</mosaic_0001>

<bundles_post_ra>
// kernel: residual_block.5
= control target key start
LH: loop header
LB: loop body
LE: loop exit
PB: predicated region body
PF: predicated region fallthrough
CT: control target
= control target key end

     0   :  { %s399_s15 = smov 0   ;;  %s430_s0 = inlined_call_operand.vmem [shape: f32[2,4,286], index: 0, kind: input, shape index: {}]   ;;  %s431_s1 = inlined_call_operand.vmem [shape: f32[4,1], index: 1, kind: input, shape index: {}]   ;;  %s432_s2 = inlined_call_operand.vmem [shape: f32[4,1], index: 2, kind: input, shape index: {}]   ;;  %s433_s3 = inlined_call_operand.vmem [shape: f32[2,4,324], index: 3, kind: input, shape index: {}]   ;;  %s434_s4 = inlined_call_operand.vmem [shape: f32[2,4,286], index: 4, kind: output, shape index: {}]  }
   0x1 LB: > { %s340_s16 = sadd.s32 4294967295, %s369_s15   ;;  %p344_p0 = scmp.ge.s32.totalorder %s369_s15, 1  ;;  %s369_s15 = sphi %s399_s15, %s14_s15  }
   0x2   : > { %p172_p1 = scmp.lt.s32.totalorder %s369_s15, 3 }
   0x4   : > { %p173_p2 = pnand %p344_p0, %p172_p1 }
   0x5   : > { %v222_v0 = vld [vmem:[%s431_s1] sm:$0xf] (!%p173_p2)  ;;  %p203_p3 = scmp.lt.s32.totalorder (!%p173_p2), %s340_s16, 1  ;;  %v371_v1 = vmov (!%p173_p2), 0   ;;  %s372_s25 = smov (!%p173_p2), 109   ;;  %v230_v7 = vlaneseq (!%p173_p2)  ;;  %vm260_vm0 = vcmask (!%p173_p2), 1043456  }
   0x6   : > { %176 = sbr.rel (%p173_p2) target bundleno = 148 (0x94), region = 36  ;;  %362 = vset.pattern.permute.xlu0 (!%p173_p2), %v371_v1  ;;  %v237_v2 = vld [vmem:[%s432_s2] sm:$0xf] (!%p173_p2)  ;;  %v373_v5 = vmov (!%p173_p2), 839922192   ;;  %vm262_vm1 = vcmask (!%p173_p2), 891904  }
   0x7   : > { %225 = vperm.xlu0 (!%p173_p2), %362, %v222_v0   ;;  %v228_v6 = vunpack.c.l.s4 (!%p173_p2), %v373_v5  ;;  %v231_v10 = vshrl.u32 (!%p173_p2), %v230_v7, 7  ;;  %vm271_vm2 = vcmask (!%p173_p2), 240640  }
   0x9   : > { %v229_v9 = vunpack.c.0.s8 (!%p173_p2), %v228_v6 }
   0xb   : > { %240 = vperm.xlu0 (!%p173_p2), %362, %v237_v2   ;;  %v232_v11 = vsub.s32 (!%p173_p2), %v229_v9, %v231_v10 }
   0xd   : > { %s436_s16 = smov (!%p203_p3, %s340_s16), 1 }
   0xe   : > { %s413_s21 = smul.u32 12, %s436_s16 }
  0x10   : > { %s212_s24 = scalar_lea.vmem %s433_s3, %s413_s21  ;;  %s207_s28 = scalar_lea.vmem %s430_s0, %s413_s21 }
  0x11   : > { %v220_v3 = vld [vmem:[%s212_s24] sm:$0xff]  ;;  %v221_v4 = vld [vmem:[%s212_s24 + $0x8] sm:$0xf]  ;;  %s217_s5 = scalar_lea.vmem %s434_s4, %s413_s21 }
  0x12   : > { %254 = vrot.lane.b32.xlu1 %v220_v3, %s372_s25  ;;  %v218_v17 = vld [vmem:[%s207_s28] sm:$0xff]  ;;  %v219_v18 = vld [vmem:[%s207_s28 + $0x8] sm:$0xf] }
  0x16   : > { %256 = vrot.lane.b32.xlu1 %v221_v4, %s372_s25 }
  0x84   : > { %v255_v8 = vpop.permute.xlu1 %254 }
  0x85   : > { %v258_v14 = vrot.slane %v255_v8, 4 }
  0x86   : > { %v226_v13 = vpop.permute.xlu0 %225 }
  0x87   : > { %v233_v16 = vrot.slane %v226_v13, %v232_v11 }
  0x88   : > { %v257_v12 = vpop.permute.xlu1 %256 }
  0x89   : > { %v259_v15 = vrot.slane %v257_v12, 4  ;;  %v235_v21 = vmul.f32 %v233_v16, %v218_v17  ;;  %v236_v22 = vmul.f32 %v233_v16, %v219_v18 }
  0x8a   : > { %v241_v19 = vpop.permute.xlu0 %240 }
  0x8b   : > { %v261_v20 = vsel %vm260_vm0, %v258_v14, %v259_v15  ;;  %v248_v23 = vrot.slane %v241_v19, %v232_v11 }
  0x8c   : > { %v263_v26 = vsel %vm262_vm1, %v255_v8, %v261_v20 }
  0x8d   : > { %v250_v24 = vadd.f32 %v248_v23, %v235_v21  ;;  %v251_v25 = vadd.f32 %v248_v23, %v236_v22 }
  0x8f   : > { %v266_v27 = vadd.f32 %v263_v26, %v250_v24  ;;  %v267_v28 = vadd.f32 %v257_v12, %v251_v25 }
  0x91   : > { %v268_v29 = vmax.f32 %v266_v27, 0.0  ;;  %v269_v30 = vmax.f32 %v267_v28, 0.0 }
  0x93   : > { %270 = vst [vmem:[%s217_s5] sm:$0xff] %v268_v29  ;;  %272 = vst.msk [vmem:[%s217_s5 + $0x8] sm:$0xf] %vm271_vm2, %v269_v30 }
  0x94 PF: > { %s14_s15 = sadd.s32 1, %s369_s15  }
  0x95   : > { %p11_p4 = scmp.ge.s32.totalorder %s14_s15, 4  }
  0x97   :  { %13 = sbr.rel (!%p11_p4) target bundleno = 1 (0x1), region = 69 }

// kernel: residual_block.3
= control target key start
LH: loop header
LB: loop body
LE: loop exit
PB: predicated region body
PF: predicated region fallthrough
CT: control target
= control target key end

     0   :  { %s2117_s18 = smov 0   ;;  %s2314_s0 = inlined_call_operand.vmem [shape: bf16[2,4,324], index: 0, kind: input, shape index: {}]   ;;  %s2315_s1 = inlined_call_operand.vmem [shape: bf16[9,4,4], index: 1, kind: input, shape index: {}]   ;;  %s2316_s2 = inlined_call_operand.vmem [shape: f32[1,324], index: 2, kind: input, shape index: {}]   ;;  %s2317_s3 = inlined_call_operand.vmem [shape: f32[2,4,324], index: 3, kind: output, shape index: {0}]   ;;  %s2318_s4 = inlined_call_operand.vmem [shape: f32[4,1], index: 4, kind: output, shape index: {1}]   ;;  %s2319_s5 = inlined_call_operand.vmem [shape: f32[4,1], index: 5, kind: output, shape index: {2}]  }
   0x1 LB: > { %s1847_s19 = sadd.s32 4294967295, %s2073_s18   ;;  %p1851_p0 = scmp.ge.s32.totalorder %s2073_s18, 1  ;;  %s2073_s18 = sphi %s2117_s18, %s16_s18  }
   0x2   : > { %p182_p1 = scmp.lt.s32.totalorder %s2073_s18, 3 }
   0x4   : > { %p183_p2 = pnand %p1851_p0, %p182_p1 }
   0x5   : > { %p210_p3 = scmp.lt.s32.totalorder (!%p183_p2), %s1847_s19, 1  ;;  %p1854_p4 = scmp.ne.s32.totalorder (!%p183_p2), %s1847_s19, 0 }
   0x6   : > { %186 = sbr.rel (%p183_p2) target bundleno = 586 (0x24a), region = 32 }
   0xd   : > { %s211_s20 = scalar_select %p210_p3, %s1847_s19, 1 }
   0xe   : > { %223 = sbr.rel (%p1854_p4) target bundleno = 21 (0x15), region = 36  ;;  %vm224_vm0 = vcmask (!%p1854_p4), 3072   ;;  %v2075_v0 = vmov (!%p1854_p4), 0.0  }
   0xf   : > { %s2005_s21 = smul.u32 6, %s211_s20  ;;  %225 = vst.msk [vmem:[%s2318_s4] sm:$0xf] (!%p1854_p4), %vm224_vm0, %v2075_v0  ;;  %226 = vst.msk [vmem:[%s2319_s5] sm:$0xf] (!%p1854_p4), %vm224_vm0, %v2075_v0 }
  0x10   : > { %s2006_s22 = smul.u32 12, %s211_s20 }
  0x11   : > { %s214_s25 = scalar_lea.vmem %s2314_s0, %s2005_s21 }
  0x12   : > { %s2131_s28 = scalar_lea.vmem %s2317_s3, %s2006_s22 }
  0x15 PF: > { %v2139_v1 = vld [vmem:[%s214_s25] sm:$0x3f]  ;;  %v2076_v4 = vmov 0.0   ;;  %vm2077_vm1 = vmmov 0   ;;  %s2078_s8 = smov 127   ;;  %s2079_s9 = smov 126   ;;  %v1729_v7 = vlaneseq }
  0x16   : > { %v2142_v2 = vunpack.c.l.bf16 %v2139_v1  ;;  %v229_v3 = vunpack.c.h.bf16 %v2139_v1  ;;  %1928 = vmatprep.subr.mxu1 %v2076_v4  ;;  %1704 = vst [vmem:[%s2131_s28] sm:$0xff] %v2076_v4  ;;  %322 = vmatprep.mubr.f32.mxu0 %v2076_v4  ;;  %s2080_s10 = smov 110   ;;  %s2081_s11 = smov 109   ;;  %v1727_v9 = vld [vmem:[%s2316_s2] sm:$0x7]  ;;  %vm251_vm2 = vcmask 1043456   ;;  %vm244_vm3 = vcmask 1039360  }
  0x17   : > { %1930 = vmatprep.mubr.msk.f32.mxu1 %vm2077_vm1, %v2076_v4  ;;  %s2082_s12 = smov 108   ;;  %s2083_s13 = smov 92   ;;  %v1730_v8 = vshrl.u32 %v1729_v7, 7  ;;  %v1855_v16 = vld [vmem:[%s2315_s1 + $0x2] sm:$0x3]  ;;  %vm247_vm4 = vcmask 31744  }
  0x18   : > { %v2153_v5 = vcombine.high %v2142_v2, %v2142_v2  ;;  %s2084_s14 = smov 91   ;;  %s2085_s15 = smov 90   ;;  %v234_v18 = vunpack.c.l.bf16 %v1855_v16  ;;  %vm558_vm5 = vcmask 1031168   ;;  %v230_v27 = vld [vmem:[%s2315_s1] sm:$0x3]  ;;  %vm723_vm6 = vcmask 900096  }
  0x19   : > { %v1731_v10 = vsub.s32 0, %v1730_v8  ;;  %v1735_v11 = vsub.s32 1, %v1730_v8  ;;  %v1739_v12 = vsub.s32 2, %v1730_v8  ;;  %v231_v29 = vunpack.c.l.bf16 %v230_v27  ;;  %v1866_v35 = vld [vmem:[%s2315_s1 + $0x4] sm:$0x3] }
  0x1a   : > { %v2027_v6 = vpack.i.bf16 %v229_v3, %v2153_v5  ;;  %v551_v38 = vunpack.c.l.bf16 %v1866_v35  ;;  %vm888_vm7 = vcmask 891904   ;;  %v1872_v43 = vld [vmem:[%s2315_s1 + $0x6] sm:$0x3]  ;;  %vm1053_vm8 = vcmask 883712   ;;  %v1878_v51 = vld [vmem:[%s2315_s1 + $0x8] sm:$0x3] }
  0x1b   : > { %v1732_v13 = vrot.slane %v1727_v9, %v1731_v10  ;;  %v1736_v14 = vrot.slane %v1727_v9, %v1735_v11  ;;  %v1740_v15 = vrot.slane %v1727_v9, %v1739_v12  ;;  %v716_v46 = vunpack.c.l.bf16 %v1872_v43  ;;  %v1884_v59 = vld [vmem:[%s2315_s1 + $0xa] sm:$0x3]  ;;  %v1896_v12 = vld [vmem:[%s2315_s1 + $0xe] sm:$0x3] }
  0x1c   : > { %2028 = vrot.lane.b32.xlu0 %v2027_v6, %s2078_s8  ;;  %2033 = vrot.lane.b32.xlu1 %v2027_v6, %s2079_s9  ;;  %v881_v54 = vunpack.c.l.bf16 %v1878_v51  ;;  %vm1218_vm9 = vcmask 752640   ;;  %v1046_v62 = vunpack.c.l.bf16 %v1884_v59  ;;  %vm1383_vm10 = vcmask 744448  }
  0x1d   : > { %vm1548_vm11 = vcmask 736256   ;;  %vm1759_vm12 = vcmask 240640   ;;  %vm1705_vm13 = vcmask 551936   ;;  %vm1765_vm14 = vcmask 3072  }
  0x1e   : > { %1706 = vst.msk [vmem:[%s2131_s28 + $0x8] sm:$0xf] %vm1705_vm13, %v2076_v4  ;;  %vm1721_vm15 = vcmask 1043608   ;;  %vm1722_vm0 = vcmask 1047556  }
  0x20   : > { %238 = vrot.lane.b32.xlu0 %v2142_v2, %s2078_s8  ;;  %552 = vrot.lane.b32.xlu1 %v2142_v2, %s2079_s9 }
  0x24   : > { %2038 = vrot.lane.b32.xlu0 %v2027_v6, %s2080_s10  ;;  %717 = vrot.lane.b32.xlu1 %v2142_v2, %s2080_s10 }
  0x28   : > { %2043 = vrot.lane.b32.xlu0 %v2027_v6, %s2081_s11  ;;  %882 = vrot.lane.b32.xlu1 %v2142_v2, %s2081_s11 }
  0x2c   : > { %2048 = vrot.lane.b32.xlu0 %v2027_v6, %s2082_s12  ;;  %1047 = vrot.lane.b32.xlu1 %v2142_v2, %s2082_s12 }
  0x30   : > { %2053 = vrot.lane.b32.xlu0 %v2027_v6, %s2083_s13  ;;  %1212 = vrot.lane.b32.xlu1 %v2142_v2, %s2083_s13  ;;  %s2086_s13 = smov 19  }
  0x34   : > { %2058 = vrot.lane.b32.xlu0 %v2027_v6, %s2084_s14  ;;  %1377 = vrot.lane.b32.xlu1 %v2142_v2, %s2084_s14 }
  0x38   : > { %2063 = vrot.lane.b32.xlu0 %v2027_v6, %s2085_s15  ;;  %1542 = vrot.lane.b32.xlu1 %v2142_v2, %s2085_s15 }
  0x3c   : > { %1741 = vrot.lane.b32.xlu0 %v1732_v13, %s2081_s11  ;;  %1743 = vrot.lane.b32.xlu1 %v1736_v14, %s2081_s11  ;;  %v1376_v14 = vunpack.c.l.bf16 %v1896_v12 }
  0x40   : > { %1745 = vrot.lane.b32.xlu0 %v1740_v15, %s2081_s11 }
  0x8e   : > { %v2029_v17 = vpop.permute.xlu0 %2028  ;;  %v2034_v19 = vpop.permute.xlu1 %2033 }
  0x8f   : > { %v2031_v20 = vunpack.i.h.bf16 %v2029_v17  ;;  %v2030_v21 = vunpack.i.l.bf16 %v2029_v17  ;;  %v2036_v22 = vunpack.i.h.bf16 %v2034_v19  ;;  %v2035_v23 = vunpack.i.l.bf16 %v2034_v19  ;;  %v1902_v17 = vld [vmem:[%s2315_s1 + $0x10] sm:$0x3] }
  0x91   : > { %1929 = vmatpush3.msk.msra.mxu1 %vm251_vm2, %v2031_v20  ;;  %v246_v24 = vsel %vm244_vm3, %v2030_v21, %v2031_v20  ;;  %v560_v28 = vsel %vm558_vm5, %v2035_v23, %v2036_v22 }
  0x92   : > { %v239_v25 = vpop.permute.xlu0 %238  ;;  %1856 = vmatprep.subr.msk.mxu0 %vm251_vm2, %v246_v24  ;;  %1931 = vmatmul.mubr.msk.f32.vlgmr.msra.gmra.mrb[0].mxu1 %vm247_vm4, %v234_v18  ;;  %v553_v31 = vpop.permute.xlu1 %552 }
  0x93   : > { %v245_v26 = vsel %vm244_vm3, %v239_v25, %v2030_v21  ;;  %1933 = vmatprep.subr.mxu1 %v2076_v4  ;;  %1935 = vmatprep.mubr.msk.f32.mxu1 %vm2077_vm1, %v2076_v4  ;;  %v559_v34 = vsel %vm558_vm5, %v553_v31, %v2035_v23  ;;  %vm1725_vm3 = vcmask 396288  }
  0x94   : > { %1857 = vmatpush1.msk.msra.mxu0 %vm251_vm2, %v245_v26  ;;  %1934 = vmatpush3.msk.msra.mxu1 %vm251_vm2, %v229_v3  ;;  %v1890_v3 = vld [vmem:[%s2315_s1 + $0xc] sm:$0x3] }
  0x95   : > { %1858 = vmatmul.mubr.msk.f32.vlgmr.msra.gmra.mrb[0].mxu0 %vm247_vm4, %v234_v18  ;;  %1861 = vmatprep.subr.msk.mxu0 %vm251_vm2, %v2153_v5  ;;  %v1211_v7 = vunpack.c.l.bf16 %v1890_v3  ;;  %v1541_v18 = vunpack.c.l.bf16 %v1902_v17 }
  0x96   : > { %1862 = vmatpush1.msk.msra.mxu0 %vm251_vm2, %v2142_v2  ;;  %1938 = vmatprep.subr.mxu1 %v2076_v4  ;;  %v2039_v30 = vpop.permute.xlu0 %2038  ;;  %v718_v39 = vpop.permute.xlu1 %717 }
  0x97   : > { %472 = vmatprep.mubr.f32.mxu0 %v2076_v4  ;;  %1867 = vmatprep.subr.msk.mxu0 %vm251_vm2, %v560_v28  ;;  %v2041_v32 = vunpack.i.h.bf16 %v2039_v30  ;;  %v2040_v33 = vunpack.i.l.bf16 %v2039_v30 }
  0x99   : > { %v725_v36 = vsel %vm723_vm6, %v2040_v33, %v2041_v32  ;;  %v724_v42 = vsel %vm723_vm6, %v718_v39, %v2040_v33 }
  0x9a   : > { %1936 = vmatmul.mubr.msk.f32.vlgmr.msra.gmra.mrb[0].mxu1 %vm247_vm4, %v231_v29  ;;  %v2044_v37 = vpop.permute.xlu0 %2043  ;;  %v883_v47 = vpop.permute.xlu1 %882 }
  0x9b   : > { %1939 = vmatpush3.msk.msra.mxu1 %vm251_vm2, %v2036_v22  ;;  %1940 = vmatprep.mubr.msk.f32.mxu1 %vm2077_vm1, %v2076_v4  ;;  %v2046_v40 = vunpack.i.h.bf16 %v2044_v37  ;;  %v2045_v41 = vunpack.i.l.bf16 %v2044_v37 }
  0x9c   : > { %1943 = vmatprep.subr.mxu1 %v2076_v4 }
  0x9d   : > { %1863 = vmatmul.mubr.msk.f32.vlgmr.msra.gmra.mrb[0].mxu0 %vm247_vm4, %v231_v29  ;;  %v890_v44 = vsel %vm888_vm7, %v2045_v41, %v2046_v40  ;;  %v889_v50 = vsel %vm888_vm7, %v883_v47, %v2045_v41  ;;  %v1767_v47 = vld [vmem:[%s2319_s5] sm:$0xf] }
  0x9e   : > { %1868 = vmatpush1.msk.msra.mxu0 %vm251_vm2, %v559_v34  ;;  %634 = vmatprep.mubr.f32.mxu0 %v2076_v4  ;;  %v2049_v45 = vpop.permute.xlu0 %2048  ;;  %v1048_v55 = vpop.permute.xlu1 %1047 }
  0x9f   : > { %1873 = vmatprep.subr.msk.mxu0 %vm251_vm2, %v725_v36  ;;  %v2051_v48 = vunpack.i.h.bf16 %v2049_v45  ;;  %v2050_v49 = vunpack.i.l.bf16 %v2049_v45  ;;  %v1755_v45 = vld [vmem:[%s2318_s4] sm:$0xf] }
  0xa1   : > { %v1055_v52 = vsel %vm1053_vm8, %v2050_v49, %v2051_v48  ;;  %v1054_v58 = vsel %vm1053_vm8, %v1048_v55, %v2050_v49 }
  0xa2   : > { %1941 = vmatmul.mubr.msk.f32.vlgmr.msra.gmra.mrb[0].mxu1 %vm247_vm4, %v551_v38  ;;  %v2054_v53 = vpop.permute.xlu0 %2053  ;;  %v1213_v63 = vpop.permute.xlu1 %1212 }
  0xa3   : > { %1944 = vmatpush3.msk.msra.mxu1 %vm251_vm2, %v2041_v32  ;;  %1945 = vmatprep.mubr.msk.f32.mxu1 %vm2077_vm1, %v2076_v4  ;;  %v2056_v56 = vunpack.i.h.bf16 %v2054_v53  ;;  %v2055_v57 = vunpack.i.l.bf16 %v2054_v53 }
  0xa4   : > { %1948 = vmatprep.subr.mxu1 %v2076_v4 }
  0xa5   : > { %1869 = vmatmul.mubr.msk.f32.vlgmr.msra.gmra.mrb[0].mxu0 %vm247_vm4, %v551_v38  ;;  %v1220_v60 = vsel %vm1218_vm9, %v2055_v57, %v2056_v56  ;;  %v1219_v2 = vsel %vm1218_vm9, %v1213_v63, %v2055_v57 }
  0xa6   : > { %1874 = vmatpush1.msk.msra.mxu0 %vm251_vm2, %v724_v42  ;;  %799 = vmatprep.mubr.f32.mxu0 %v2076_v4  ;;  %v2059_v61 = vpop.permute.xlu0 %2058  ;;  %v1378_v8 = vpop.permute.xlu1 %1377 }
  0xa7   : > { %1879 = vmatprep.subr.msk.mxu0 %vm251_vm2, %v890_v44  ;;  %v2061_v0 = vunpack.i.h.bf16 %v2059_v61  ;;  %v2060_v1 = vunpack.i.l.bf16 %v2059_v61 }
  0xa9   : > { %v1385_v5 = vsel %vm1383_vm10, %v2060_v1, %v2061_v0  ;;  %v1384_v11 = vsel %vm1383_vm10, %v1378_v8, %v2060_v1 }
  0xaa   : > { %1946 = vmatmul.mubr.msk.f32.vlgmr.msra.gmra.mrb[0].mxu1 %vm247_vm4, %v716_v46  ;;  %v2064_v6 = vpop.permute.xlu0 %2063  ;;  %v1543_v15 = vpop.permute.xlu1 %1542 }
  0xab   : > { %1949 = vmatpush3.msk.msra.mxu1 %vm251_vm2, %v2046_v40  ;;  %1950 = vmatprep.mubr.msk.f32.mxu1 %vm2077_vm1, %v2076_v4  ;;  %v2066_v9 = vunpack.i.h.bf16 %v2064_v6  ;;  %v2065_v10 = vunpack.i.l.bf16 %v2064_v6 }
  0xac   : > { %1953 = vmatprep.subr.mxu1 %v2076_v4 }
  0xad   : > { %1875 = vmatmul.mubr.msk.f32.vlgmr.msra.gmra.mrb[0].mxu0 %vm247_vm4, %v716_v46  ;;  %v1550_v13 = vsel %vm1548_vm11, %v2065_v10, %v2066_v9  ;;  %v1549_v16 = vsel %vm1548_vm11, %v1543_v15, %v2065_v10 }
  0xae   : > { %1880 = vmatpush1.msk.msra.mxu0 %vm251_vm2, %v889_v50  ;;  %964 = vmatprep.mubr.f32.mxu0 %v2076_v4  ;;  %v1742_v19 = vpop.permute.xlu0 %1741  ;;  %v1744_v20 = vpop.permute.xlu1 %1743 }
  0xaf   : > { %1885 = vmatprep.subr.msk.mxu0 %vm251_vm2, %v1055_v52  ;;  %v1747_v25 = vsel %vm888_vm7, %v1742_v19, %v1744_v20 }
  0xb2   : > { %1951 = vmatmul.mubr.msk.f32.vlgmr.msra.gmra.mrb[0].mxu1 %vm247_vm4, %v881_v54  ;;  %v1746_v21 = vpop.permute.xlu0 %1745 }
  0xb3   : > { %1954 = vmatpush3.msk.msra.mxu1 %vm251_vm2, %v2051_v48  ;;  %1955 = vmatprep.mubr.msk.f32.mxu1 %vm2077_vm1, %v2076_v4  ;;  %v1748_v24 = vsel %vm888_vm7, %v1744_v20, %v1746_v21 }
  0xb4   : > { %1958 = vmatprep.subr.mxu1 %v2076_v4 }
  0xb5   : > { %1881 = vmatmul.mubr.msk.f32.vlgmr.msra.gmra.mrb[0].mxu0 %vm247_vm4, %v881_v54 }
  0xb6   : > { %1886 = vmatpush1.msk.msra.mxu0 %vm251_vm2, %v1054_v58  ;;  %1129 = vmatprep.mubr.f32.mxu0 %v2076_v4 }
  0xb7   : > { %1891 = vmatprep.subr.msk.mxu0 %vm251_vm2, %v1220_v60 }
  0xba   : > { %1956 = vmatmul.mubr.msk.f32.vlgmr.msra.gmra.mrb[0].mxu1 %vm247_vm4, %v1046_v62 }
  0xbb   : > { %1959 = vmatpush3.msk.msra.mxu1 %vm251_vm2, %v2056_v56  ;;  %1960 = vmatprep.mubr.msk.f32.mxu1 %vm2077_vm1, %v2076_v4 }
  0xbc   : > { %1963 = vmatprep.subr.mxu1 %v2076_v4 }
  0xbd   : > { %1887 = vmatmul.mubr.msk.f32.vlgmr.msra.gmra.mrb[0].mxu0 %vm247_vm4, %v1046_v62 }
  0xbe   : > { %1892 = vmatpush1.msk.msra.mxu0 %vm251_vm2, %v1219_v2  ;;  %1294 = vmatprep.mubr.f32.mxu0 %v2076_v4 }
  0xbf   : > { %1897 = vmatprep.subr.msk.mxu0 %vm251_vm2, %v1385_v5 }
  0xc2   : > { %1961 = vmatmul.mubr.msk.f32.vlgmr.msra.gmra.mrb[0].mxu1 %vm247_vm4, %v1211_v7 }
  0xc3   : > { %1964 = vmatpush3.msk.msra.mxu1 %vm251_vm2, %v2061_v0  ;;  %1965 = vmatprep.mubr.msk.f32.mxu1 %vm2077_vm1, %v2076_v4 }
  0xc4   : > { %1968 = vmatprep.subr.mxu1 %v2076_v4 }
  0xc5   : > { %1893 = vmatmul.mubr.msk.f32.vlgmr.msra.gmra.mrb[0].mxu0 %vm247_vm4, %v1211_v7 }
  0xc6   : > { %1898 = vmatpush1.msk.msra.mxu0 %vm251_vm2, %v1384_v11  ;;  %1459 = vmatprep.mubr.f32.mxu0 %v2076_v4 }
  0xc7   : > { %1903 = vmatprep.subr.msk.mxu0 %vm251_vm2, %v1550_v13 }
  0xca   : > { %1966 = vmatmul.mubr.msk.f32.vlgmr.msra.gmra.mrb[0].mxu1 %vm247_vm4, %v1376_v14 }
  0xcb   : > { %1969 = vmatpush3.msk.msra.mxu1 %vm251_vm2, %v2066_v9  ;;  %1970 = vmatprep.mubr.msk.f32.mxu1 %vm2077_vm1, %v2076_v4  ;;  %vm1716_vm1 = vcmask 154624  }
  0xcd   : > { %1899 = vmatmul.mubr.msk.f32.vlgmr.msra.gmra.mrb[0].mxu0 %vm247_vm4, %v1376_v14 }
  0xce   : > { %1904 = vmatpush1.msk.msra.mxu0 %vm251_vm2, %v1549_v16  ;;  %1624 = vmatprep.mubr.f32.mxu0 %v2076_v4 }
  0xd2   : > { %1971 = vmatmul.mubr.msk.f32.vlgmr.msra.gmra.mrb[0].mxu1 %vm247_vm4, %v1541_v18 }
  0xd5   : > { %1905 = vmatmul.mubr.msk.f32.vlgmr.msra.gmra.mrb[0].mxu0 %vm247_vm4, %v1541_v18 }
 0x1a5   : > { %v1697_v22 = vpop.f32.mrb[0].mxu1 }
 0x1a6   : > { %v1972_v23 = vpop.f32.mrb[1].mxu1  ;;  %v1754_v26 = vmul.f32 %v1746_v21, %v1697_v22 }
 0x1a8   : > { %v1626_v27 = vpop.f32.mrb[0].mxu0  ;;  %v1770_v34 = vmul.f32 %v1754_v26, %v1697_v22  ;;  %v1760_v40 = vsel %vm1759_vm12, %v1754_v26, 0.0 }
 0x1a9   : > { %v1752_v28 = vmul.f32 %v1747_v25, %v1626_v27  ;;  %v1628_v29 = vpop.f32.mrb[1].mxu0 }
 0x1aa   : > { %v1710_v30 = vcombine.low %v1626_v27, %v1628_v29  ;;  %v1753_v31 = vmul.f32 %v1748_v24, %v1628_v29  ;;  %v1774_v43 = vsel %vm1759_vm12, %v1770_v34, 0.0 }
 0x1ab   : > { %v1768_v32 = vmul.f32 %v1752_v28, %v1626_v27  ;;  %v1756_v33 = vsel %vm251_vm2, %v1752_v28, 0.0 }
 0x1ac   : > { %v1757_v35 = vsel %vm251_vm2, %v1753_v31, 0.0  ;;  %v1769_v36 = vmul.f32 %v1753_v31, %v1628_v29 }
 0x1ad   : > { %v1758_v37 = vadd.f32 %v1757_v35, %v1756_v33  ;;  %v1771_v38 = vsel %vm251_vm2, %v1768_v32, 0.0 }
 0x1ae   : > { %v1772_v39 = vsel %vm251_vm2, %v1769_v36, 0.0  ;;  %vm1723_vm2 = vmor %vm1722_vm0, %vm1721_vm15 }
 0x1af   : > { %v1761_v41 = vadd.f32 %v1760_v40, %v1758_v37  ;;  %v1773_v42 = vadd.f32 %v1772_v39, %v1771_v38 }
 0x1b1   : > { %1762 = vadd.xlane.f32.xlu1 %v1761_v41  ;;  %v1775_v44 = vadd.f32 %v1774_v43, %v1773_v42 }
 0x1b3   : > { %1776 = vadd.xlane.f32.xlu0 %v1775_v44 }
 0x1c2   : > { %1713 = vrot.lane.b32.xlu1 %v1697_v22, %s2086_s13 }
 0x1c9   : > { %1711 = vrot.lane.b32.xlu0 %v1710_v30, %s2086_s13 }
 0x23e   : > { %v1763_v46 = vpop.xlane.xlu1 %1762 }
 0x23f   : > { %v1764_v48 = vadd.f32 %v1763_v46, %v1755_v45 }
 0x240   : > { %v1777_v49 = vpop.xlane.xlu0 %1776 }
 0x241   : > { %1766 = vst.msk [vmem:[%s2318_s4] sm:$0xf] %vm1765_vm14, %v1764_v48  ;;  %v1778_v4 = vadd.f32 %v1777_v49, %v1767_v47 }
 0x242   : > { %v1714_v52 = vpop.permute.xlu1 %1713 }
 0x243   : > { %1779 = vst.msk [vmem:[%s2319_s5] sm:$0xf] %vm1765_vm14, %v1778_v4 }
 0x244   : > { %v1712_v50 = vpop.permute.xlu0 %1711 }
 0x245   : > { %v1715_v51 = vrot.slane %v1712_v50, 4 }
 0x247   : > { %v1717_v53 = vsel %vm1716_vm1, %v1715_v51, %v1712_v50  ;;  %v1718_v54 = vsel %vm1716_vm1, %v1715_v51, %v1714_v52 }
 0x248   : > { %1724 = vst.msk [vmem:[%s2131_s28] sm:$0xff] %vm1723_vm2, %v1717_v53 }
 0x249   : > { %1726 = vst.msk [vmem:[%s2131_s28 + $0x8] sm:$0xf] %vm1725_vm3, %v1718_v54 }
 0x24a PF: > { %s16_s18 = sadd.s32 1, %s2073_s18  }
 0x24b   : > { %p13_p5 = scmp.ge.s32.totalorder %s16_s18, 4  }
 0x24d   :  { %15 = sbr.rel (!%p13_p5) target bundleno = 1 (0x1), region = 90 }

// kernel: residual_block.4
= control target key start
LH: loop header
LB: loop body
LE: loop exit
PB: predicated region body
PF: predicated region fallthrough
CT: control target
= control target key end

     0   :  { %s2225_s24 = smov 0   ;;  %s2413_s0 = inlined_call_operand.vmem [shape: f32[2,4,324], index: 0, kind: input, shape index: {}]   ;;  %s2414_s1 = inlined_call_operand.vmem [shape: f32[4,1], index: 1, kind: input, shape index: {}]   ;;  %s2415_s2 = inlined_call_operand.vmem [shape: f32[4,1], index: 2, kind: input, shape index: {}]   ;;  %s2416_s3 = inlined_call_operand.vmem [shape: bf16[9,4,4], index: 3, kind: input, shape index: {}]   ;;  %s2417_s4 = inlined_call_operand.vmem [shape: f32[1,324], index: 4, kind: input, shape index: {}]   ;;  %s2418_s5 = inlined_call_operand.vmem [shape: f32[2,4,286], index: 5, kind: output, shape index: {0}]   ;;  %s2419_s6 = inlined_call_operand.vmem [shape: f32[4,1], index: 6, kind: output, shape index: {1}]   ;;  %s2420_s7 = inlined_call_operand.vmem [shape: f32[4,1], index: 7, kind: output, shape index: {2}]  }
   0x1 LB: > { %s1943_s25 = sadd.s32 4294967295, %s2170_s24   ;;  %p1947_p0 = scmp.ge.s32.totalorder %s2170_s24, 1  ;;  %s2170_s24 = sphi %s2225_s24, %s18_s24  }
   0x2   : > { %p232_p1 = scmp.lt.s32.totalorder %s2170_s24, 3 }
   0x4   : > { %p233_p2 = pnand %p1947_p0, %p232_p1 }
   0x5   : > { %p264_p3 = scmp.lt.s32.totalorder (!%p233_p2), %s1943_s25, 1  ;;  %p1950_p4 = scmp.ne.s32.totalorder (!%p233_p2), %s1943_s25, 0 }
   0x6   : > { %236 = sbr.rel (%p233_p2) target bundleno = 723 (0x2d3), region = 40 }
   0xd   : > { %s265_s26 = scalar_select %p264_p3, %s1943_s25, 1 }
   0xe   : > { %277 = sbr.rel (%p1950_p4) target bundleno = 21 (0x15), region = 44  ;;  %vm278_vm0 = vcmask (!%p1950_p4), 3072   ;;  %v2172_v0 = vmov (!%p1950_p4), 0.0  }
   0xf   : > { %s2101_s27 = smul.u32 12, %s265_s26  ;;  %279 = vst.msk [vmem:[%s2419_s6] sm:$0xf] (!%p1950_p4), %vm278_vm0, %v2172_v0  ;;  %280 = vst.msk [vmem:[%s2420_s7] sm:$0xf] (!%p1950_p4), %vm278_vm0, %v2172_v0 }
  0x11   : > { %s268_s30 = scalar_lea.vmem %s2413_s0, %s2101_s27  ;;  %s2239_s10 = scalar_lea.vmem %s2418_s5, %s2101_s27 }
  0x15 PF: > { %v283_v1 = vld [vmem:[%s2414_s1] sm:$0xf]  ;;  %v2173_v2 = vmov 0   ;;  %v2174_v4 = vmov 839922192   ;;  %v291_v6 = vlaneseq  ;;  %v2175_v30 = vmov 0.0  }
  0x16   : > { %2123 = vset.pattern.permute.xlu0 %v2173_v2  ;;  %v298_v3 = vld [vmem:[%s2415_s2] sm:$0xf]  ;;  %v289_v5 = vunpack.c.l.s4 %v2174_v4  ;;  %v282_v16 = vld [vmem:[%s268_s30 + $0x8] sm:$0xf]  ;;  %2024 = vmatprep.subr.mxu1 %v2175_v30  ;;  %vm2176_vm1 = vmmov 0   ;;  %s2177_s21 = smov 126  }
  0x17   : > { %286 = vperm.xlu0 %2123, %v283_v1   ;;  %v2253_v8 = vshrl.u32 %v291_v6, 7  ;;  %v315_v13 = vld [vmem:[%s2417_s4] sm:$0x7]  ;;  %435 = vmatprep.mubr.f32.mxu0 %v2175_v30  ;;  %s2178_s22 = smov 127   ;;  %s2179_s23 = smov 110   ;;  %vm364_vm2 = vcmask 1043456  }
  0x18   : > { %v290_v7 = vunpack.c.0.s8 %v289_v5  ;;  %v281_v15 = vld [vmem:[%s268_s30] sm:$0xff]  ;;  %2026 = vmatprep.mubr.msk.f32.mxu1 %vm2176_vm1, %v2175_v30  ;;  %s2180_s25 = smov 109   ;;  %s2181_s26 = smov 108   ;;  %vm357_vm3 = vcmask 1039360   ;;  %vm360_vm4 = vcmask 31744   ;;  %vm671_vm5 = vcmask 1031168  }
  0x19   : > { %v319_v10 = vsub.s32 0, %v2253_v8  ;;  %v323_v11 = vsub.s32 1, %v2253_v8  ;;  %v327_v19 = vsub.s32 2, %v2253_v8  ;;  %s2182_s27 = smov 92   ;;  %s2183_s28 = smov 91   ;;  %vm836_vm6 = vcmask 900096  }
  0x1a   : > { %v293_v9 = vsub.s32 %v290_v7, %v2253_v8  ;;  %s2184_s29 = smov 90   ;;  %v1824_v41 = vld [vmem:[%s2417_s4] sm:$0x7]  ;;  %v1962_v63 = vld [vmem:[%s2416_s3 + $0x4] sm:$0x3]  ;;  %vm1001_vm7 = vcmask 891904  }
  0x1b   : > { %301 = vperm.xlu0 %2123, %v298_v3   ;;  %v320_v17 = vrot.slane %v315_v13, %v319_v10  ;;  %v324_v18 = vrot.slane %v315_v13, %v323_v11  ;;  %v328_v24 = vrot.slane %v315_v13, %v327_v19  ;;  %v1829_v42 = vrot.slane %v1824_v41, %v319_v10  ;;  %v1951_v45 = vld [vmem:[%s2416_s3 + $0x2] sm:$0x3]  ;;  %v343_v56 = vld [vmem:[%s2416_s3] sm:$0x3]  ;;  %v1968_v7 = vld [vmem:[%s2416_s3 + $0x6] sm:$0x3] }
  0x1c   : > { %v1833_v43 = vrot.slane %v1824_v41, %v323_v11  ;;  %v1837_v44 = vrot.slane %v1824_v41, %v327_v19  ;;  %v347_v47 = vunpack.c.l.bf16 %v1951_v45  ;;  %v344_v58 = vunpack.c.l.bf16 %v343_v56  ;;  %v1998_v45 = vld [vmem:[%s2416_s3 + $0x10] sm:$0x3] }
  0x1d   : > { %v330_v25 = vcombine.low %v320_v17, %v324_v18  ;;  %v664_v2 = vunpack.c.l.bf16 %v1962_v63  ;;  %v829_v10 = vunpack.c.l.bf16 %v1968_v7  ;;  %vm1166_vm8 = vcmask 883712  }
  0x1e   : > { %vm1331_vm9 = vcmask 752640   ;;  %vm1496_vm10 = vcmask 744448   ;;  %vm1661_vm11 = vcmask 736256   ;;  %vm1822_vm12 = vcmask 240640  }
  0x1f   : > { %vm1861_vm13 = vcmask 3072  }
  0x96   : > { %v287_v12 = vpop.permute.xlu0 %286 }
  0x97   : > { %v294_v14 = vrot.slane %v287_v12, %v293_v9 }
  0x99   : > { %v296_v21 = vmul.f32 %v294_v14, %v281_v15  ;;  %v297_v22 = vmul.f32 %v294_v14, %v282_v16  ;;  %v1974_v15 = vld [vmem:[%s2416_s3 + $0x8] sm:$0x3] }
  0x9a   : > { %v302_v20 = vpop.permute.xlu0 %301  ;;  %v994_v18 = vunpack.c.l.bf16 %v1974_v15 }
  0x9b   : > { %v309_v23 = vrot.slane %v302_v20, %v293_v9 }
  0x9d   : > { %v311_v26 = vadd.f32 %v309_v23, %v296_v21  ;;  %v312_v27 = vadd.f32 %v309_v23, %v297_v22  ;;  %v1980_v23 = vld [vmem:[%s2416_s3 + $0xa] sm:$0x3] }
  0x9f   : > { %v313_v28 = vmax.f32 %v311_v26, 0.0  ;;  %v314_v29 = vmax.f32 %v312_v27, 0.0  ;;  %v1159_v26 = vunpack.c.l.bf16 %v1980_v23 }
  0xa1   : > { %v332_v31 = vmul.f32 %v330_v25, %v313_v28  ;;  %v333_v32 = vmul.f32 %v328_v24, %v314_v29 }
  0xa3   : > { %v335_v33 = vcombine.high %v332_v31, %v332_v31  ;;  %v339_v34 = vpack.c.bf16 %v333_v32, %v333_v32  ;;  %v337_v38 = vpack.c.bf16 %v332_v31, %v332_v31  ;;  %v1986_v32 = vld [vmem:[%s2416_s3 + $0xc] sm:$0x3] }
  0xa5   : > { %v338_v35 = vpack.c.bf16 %v335_v33, %v335_v33  ;;  %v342_v37 = vunpack.c.l.bf16 %v339_v34  ;;  %v340_v40 = vunpack.c.l.bf16 %v337_v38 }
  0xa7   : > { %v341_v36 = vunpack.c.l.bf16 %v338_v35  ;;  %v1324_v35 = vunpack.c.l.bf16 %v1986_v32 }
  0xa9   : > { %v2129_v39 = vpack.i.bf16 %v342_v37, %v341_v36 }
  0xab   : > { %2130 = vrot.lane.b32.xlu0 %v2129_v39, %s2177_s21  ;;  %2125 = vrot.lane.b32.xlu1 %v2129_v39, %s2178_s22 }
  0xaf   : > { %2135 = vrot.lane.b32.xlu0 %v2129_v39, %s2179_s23  ;;  %351 = vrot.lane.b32.xlu1 %v340_v40, %s2178_s22 }
  0xb3   : > { %2140 = vrot.lane.b32.xlu0 %v2129_v39, %s2180_s25  ;;  %665 = vrot.lane.b32.xlu1 %v340_v40, %s2177_s21 }
  0xb7   : > { %2145 = vrot.lane.b32.xlu0 %v2129_v39, %s2181_s26  ;;  %830 = vrot.lane.b32.xlu1 %v340_v40, %s2179_s23 }
  0xbb   : > { %2150 = vrot.lane.b32.xlu0 %v2129_v39, %s2182_s27  ;;  %995 = vrot.lane.b32.xlu1 %v340_v40, %s2180_s25 }
  0xbf   : > { %2155 = vrot.lane.b32.xlu0 %v2129_v39, %s2183_s28  ;;  %1160 = vrot.lane.b32.xlu1 %v340_v40, %s2181_s26 }
  0xc3   : > { %2160 = vrot.lane.b32.xlu0 %v2129_v39, %s2184_s29  ;;  %1325 = vrot.lane.b32.xlu1 %v340_v40, %s2182_s27 }
  0xc7   : > { %1490 = vrot.lane.b32.xlu1 %v340_v40, %s2183_s28  ;;  %1838 = vrot.lane.b32.xlu0 %v1829_v42, %s2180_s25 }
  0xcb   : > { %1655 = vrot.lane.b32.xlu1 %v340_v40, %s2184_s29  ;;  %1842 = vrot.lane.b32.xlu0 %v1837_v44, %s2180_s25 }
  0xcf   : > { %1840 = vrot.lane.b32.xlu1 %v1833_v43, %s2180_s25 }
 0x11d   : > { %v2126_v46 = vpop.permute.xlu1 %2125  ;;  %v2131_v48 = vpop.permute.xlu0 %2130 }
 0x11e   : > { %v2128_v49 = vunpack.i.h.bf16 %v2126_v46  ;;  %v2127_v50 = vunpack.i.l.bf16 %v2126_v46  ;;  %v2133_v52 = vunpack.i.h.bf16 %v2131_v48  ;;  %v2132_v53 = vunpack.i.l.bf16 %v2131_v48 }
 0x120   : > { %2025 = vmatpush3.msk.msra.mxu1 %vm364_vm2, %v2128_v49  ;;  %v359_v51 = vsel %vm357_vm3, %v2127_v50, %v2128_v49  ;;  %v673_v57 = vsel %vm671_vm5, %v2132_v53, %v2133_v52 }
 0x121   : > { %v352_v54 = vpop.permute.xlu1 %351  ;;  %1952 = vmatprep.subr.msk.mxu0 %vm364_vm2, %v359_v51  ;;  %2027 = vmatmul.mubr.msk.f32.vlgmr.msra.gmra.mrb[0].mxu1 %vm360_vm4, %v347_v47  ;;  %v2136_v59 = vpop.permute.xlu0 %2135 }
 0x122   : > { %2029 = vmatprep.subr.mxu1 %v2175_v30  ;;  %v358_v55 = vsel %vm357_vm3, %v352_v54, %v2127_v50  ;;  %2031 = vmatprep.mubr.msk.f32.mxu1 %vm2176_vm1, %v2175_v30  ;;  %v2138_v60 = vunpack.i.h.bf16 %v2136_v59  ;;  %v2137_v61 = vunpack.i.l.bf16 %v2136_v59 }
 0x123   : > { %2030 = vmatpush3.msk.msra.mxu1 %vm364_vm2, %v342_v37  ;;  %1953 = vmatpush1.msk.msra.mxu0 %vm364_vm2, %v358_v55 }
 0x124   : > { %1954 = vmatmul.mubr.msk.f32.vlgmr.msra.gmra.mrb[0].mxu0 %vm360_vm4, %v347_v47  ;;  %1957 = vmatprep.subr.msk.mxu0 %vm364_vm2, %v341_v36  ;;  %v838_v1 = vsel %vm836_vm6, %v2137_v61, %v2138_v60  ;;  %v1654_v47 = vunpack.c.l.bf16 %v1998_v45 }
 0x125   : > { %1958 = vmatpush1.msk.msra.mxu0 %vm364_vm2, %v340_v40  ;;  %2034 = vmatprep.subr.mxu1 %v2175_v30  ;;  %v666_v62 = vpop.permute.xlu1 %665  ;;  %v2141_v3 = vpop.permute.xlu0 %2140  ;;  %v1992_v40 = vld [vmem:[%s2416_s3 + $0xe] sm:$0x3] }
 0x126   : > { %1963 = vmatprep.subr.msk.mxu0 %vm364_vm2, %v673_v57  ;;  %585 = vmatprep.mubr.f32.mxu0 %v2175_v30  ;;  %v672_v0 = vsel %vm671_vm5, %v666_v62, %v2132_v53  ;;  %v2143_v4 = vunpack.i.h.bf16 %v2141_v3  ;;  %v2142_v5 = vunpack.i.l.bf16 %v2141_v3  ;;  %v1489_v43 = vunpack.c.l.bf16 %v1992_v40 }
 0x128   : > { %v1003_v9 = vsel %vm1001_vm7, %v2142_v5, %v2143_v4 }
 0x129   : > { %2032 = vmatmul.mubr.msk.f32.vlgmr.msra.gmra.mrb[0].mxu1 %vm360_vm4, %v344_v58  ;;  %v831_v6 = vpop.permute.xlu1 %830  ;;  %v2146_v11 = vpop.permute.xlu0 %2145 }
 0x12a   : > { %2035 = vmatpush3.msk.msra.mxu1 %vm364_vm2, %v2133_v52  ;;  %2036 = vmatprep.mubr.msk.f32.mxu1 %vm2176_vm1, %v2175_v30  ;;  %v837_v8 = vsel %vm836_vm6, %v831_v6, %v2137_v61  ;;  %v2148_v12 = vunpack.i.h.bf16 %v2146_v11  ;;  %v2147_v13 = vunpack.i.l.bf16 %v2146_v11  ;;  %v1863_v11 = vld [vmem:[%s2420_s7] sm:$0xf] }
 0x12b   : > { %2039 = vmatprep.subr.mxu1 %v2175_v30 }
 0x12c   : > { %1959 = vmatmul.mubr.msk.f32.vlgmr.msra.gmra.mrb[0].mxu0 %vm360_vm4, %v344_v58  ;;  %v1168_v17 = vsel %vm1166_vm8, %v2147_v13, %v2148_v12 }
 0x12d   : > { %1964 = vmatpush1.msk.msra.mxu0 %vm364_vm2, %v672_v0  ;;  %747 = vmatprep.mubr.f32.mxu0 %v2175_v30  ;;  %v996_v14 = vpop.permute.xlu1 %995  ;;  %v2151_v19 = vpop.permute.xlu0 %2150 }
 0x12e   : > { %1969 = vmatprep.subr.msk.mxu0 %vm364_vm2, %v838_v1  ;;  %v1002_v16 = vsel %vm1001_vm7, %v996_v14, %v2142_v5  ;;  %v2153_v20 = vunpack.i.h.bf16 %v2151_v19  ;;  %v2152_v21 = vunpack.i.l.bf16 %v2151_v19 }
 0x130   : > { %v1333_v25 = vsel %vm1331_vm9, %v2152_v21, %v2153_v20 }
 0x131   : > { %2037 = vmatmul.mubr.msk.f32.vlgmr.msra.gmra.mrb[0].mxu1 %vm360_vm4, %v664_v2  ;;  %v1161_v22 = vpop.permute.xlu1 %1160  ;;  %v2156_v27 = vpop.permute.xlu0 %2155 }
 0x132   : > { %2040 = vmatpush3.msk.msra.mxu1 %vm364_vm2, %v2138_v60  ;;  %2041 = vmatprep.mubr.msk.f32.mxu1 %vm2176_vm1, %v2175_v30  ;;  %v1167_v24 = vsel %vm1166_vm8, %v1161_v22, %v2147_v13  ;;  %v2158_v28 = vunpack.i.h.bf16 %v2156_v27  ;;  %v2157_v29 = vunpack.i.l.bf16 %v2156_v27 }
 0x133   : > { %2044 = vmatprep.subr.mxu1 %v2175_v30 }
 0x134   : > { %1965 = vmatmul.mubr.msk.f32.vlgmr.msra.gmra.mrb[0].mxu0 %vm360_vm4, %v664_v2  ;;  %v1498_v34 = vsel %vm1496_vm10, %v2157_v29, %v2158_v28 }
 0x135   : > { %1970 = vmatpush1.msk.msra.mxu0 %vm364_vm2, %v837_v8  ;;  %912 = vmatprep.mubr.f32.mxu0 %v2175_v30  ;;  %v1326_v31 = vpop.permute.xlu1 %1325  ;;  %v2161_v36 = vpop.permute.xlu0 %2160 }
 0x136   : > { %1975 = vmatprep.subr.msk.mxu0 %vm364_vm2, %v1003_v9  ;;  %v1332_v33 = vsel %vm1331_vm9, %v1326_v31, %v2152_v21  ;;  %v2163_v37 = vunpack.i.h.bf16 %v2161_v36  ;;  %v2162_v38 = vunpack.i.l.bf16 %v2161_v36  ;;  %v1852_v9 = vld [vmem:[%s2419_s6] sm:$0xf] }
 0x138   : > { %v1663_v42 = vsel %vm1661_vm11, %v2162_v38, %v2163_v37 }
 0x139   : > { %2042 = vmatmul.mubr.msk.f32.vlgmr.msra.gmra.mrb[0].mxu1 %vm360_vm4, %v829_v10  ;;  %v1491_v39 = vpop.permute.xlu1 %1490  ;;  %v1839_v48 = vpop.permute.xlu0 %1838 }
 0x13a   : > { %2045 = vmatpush3.msk.msra.mxu1 %vm364_vm2, %v2143_v4  ;;  %2046 = vmatprep.mubr.msk.f32.mxu1 %vm2176_vm1, %v2175_v30  ;;  %v1497_v41 = vsel %vm1496_vm10, %v1491_v39, %v2157_v29 }
 0x13b   : > { %2049 = vmatprep.subr.mxu1 %v2175_v30 }
 0x13c   : > { %1971 = vmatmul.mubr.msk.f32.vlgmr.msra.gmra.mrb[0].mxu0 %vm360_vm4, %v829_v10 }
 0x13d   : > { %1976 = vmatpush1.msk.msra.mxu0 %vm364_vm2, %v1002_v16  ;;  %1077 = vmatprep.mubr.f32.mxu0 %v2175_v30  ;;  %v1656_v44 = vpop.permute.xlu1 %1655  ;;  %v1843_v50 = vpop.permute.xlu0 %1842 }
 0x13e   : > { %1981 = vmatprep.subr.msk.mxu0 %vm364_vm2, %v1168_v17  ;;  %v1662_v46 = vsel %vm1661_vm11, %v1656_v44, %v2162_v38 }
 0x141   : > { %2047 = vmatmul.mubr.msk.f32.vlgmr.msra.gmra.mrb[0].mxu1 %vm360_vm4, %v994_v18  ;;  %v1841_v49 = vpop.permute.xlu1 %1840 }
 0x142   : > { %2050 = vmatpush3.msk.msra.mxu1 %vm364_vm2, %v2148_v12  ;;  %2051 = vmatprep.mubr.msk.f32.mxu1 %vm2176_vm1, %v2175_v30  ;;  %v1845_v53 = vsel %vm1001_vm7, %v1841_v49, %v1843_v50  ;;  %v1844_v54 = vsel %vm1001_vm7, %v1839_v48, %v1841_v49 }
 0x143   : > { %2054 = vmatprep.subr.mxu1 %v2175_v30 }
 0x144   : > { %1977 = vmatmul.mubr.msk.f32.vlgmr.msra.gmra.mrb[0].mxu0 %vm360_vm4, %v994_v18 }
 0x145   : > { %1982 = vmatpush1.msk.msra.mxu0 %vm364_vm2, %v1167_v24  ;;  %1242 = vmatprep.mubr.f32.mxu0 %v2175_v30 }
 0x146   : > { %1987 = vmatprep.subr.msk.mxu0 %vm364_vm2, %v1333_v25 }
 0x149   : > { %2052 = vmatmul.mubr.msk.f32.vlgmr.msra.gmra.mrb[0].mxu1 %vm360_vm4, %v1159_v26 }
 0x14a   : > { %2055 = vmatpush3.msk.msra.mxu1 %vm364_vm2, %v2153_v20  ;;  %2056 = vmatprep.mubr.msk.f32.mxu1 %vm2176_vm1, %v2175_v30 }
 0x14b   : > { %2059 = vmatprep.subr.mxu1 %v2175_v30 }
 0x14c   : > { %1983 = vmatmul.mubr.msk.f32.vlgmr.msra.gmra.mrb[0].mxu0 %vm360_vm4, %v1159_v26 }
 0x14d   : > { %1988 = vmatpush1.msk.msra.mxu0 %vm364_vm2, %v1332_v33  ;;  %1407 = vmatprep.mubr.f32.mxu0 %v2175_v30 }
 0x14e   : > { %1993 = vmatprep.subr.msk.mxu0 %vm364_vm2, %v1498_v34 }
 0x151   : > { %2057 = vmatmul.mubr.msk.f32.vlgmr.msra.gmra.mrb[0].mxu1 %vm360_vm4, %v1324_v35 }
 0x152   : > { %2060 = vmatpush3.msk.msra.mxu1 %vm364_vm2, %v2158_v28  ;;  %2061 = vmatprep.mubr.msk.f32.mxu1 %vm2176_vm1, %v2175_v30 }
 0x153   : > { %2064 = vmatprep.subr.mxu1 %v2175_v30 }
 0x154   : > { %1989 = vmatmul.mubr.msk.f32.vlgmr.msra.gmra.mrb[0].mxu0 %vm360_vm4, %v1324_v35 }
 0x155   : > { %1994 = vmatpush1.msk.msra.mxu0 %vm364_vm2, %v1497_v41  ;;  %1572 = vmatprep.mubr.f32.mxu0 %v2175_v30 }
 0x156   : > { %1999 = vmatprep.subr.msk.mxu0 %vm364_vm2, %v1663_v42 }
 0x159   : > { %2062 = vmatmul.mubr.msk.f32.vlgmr.msra.gmra.mrb[0].mxu1 %vm360_vm4, %v1489_v43 }
 0x15a   : > { %2065 = vmatpush3.msk.msra.mxu1 %vm364_vm2, %v2163_v37  ;;  %2066 = vmatprep.mubr.msk.f32.mxu1 %vm2176_vm1, %v2175_v30 }
 0x15c   : > { %1995 = vmatmul.mubr.msk.f32.vlgmr.msra.gmra.mrb[0].mxu0 %vm360_vm4, %v1489_v43 }
 0x15d   : > { %2000 = vmatpush1.msk.msra.mxu0 %vm364_vm2, %v1662_v46  ;;  %1737 = vmatprep.mubr.f32.mxu0 %v2175_v30 }
 0x161   : > { %2067 = vmatmul.mubr.msk.f32.vlgmr.msra.gmra.mrb[0].mxu1 %vm360_vm4, %v1654_v47 }
 0x164   : > { %2001 = vmatmul.mubr.msk.f32.vlgmr.msra.gmra.mrb[0].mxu0 %vm360_vm4, %v1654_v47 }
 0x234   : > { %v1810_v51 = vpop.f32.mrb[0].mxu1 }
 0x235   : > { %1823 = vst.msk [vmem:[%s2239_s10 + $0x8] sm:$0xf] %vm1822_vm12, %v1810_v51  ;;  %v2068_v52 = vpop.f32.mrb[1].mxu1  ;;  %v1851_v55 = vmul.f32 %v1843_v50, %v1810_v51 }
 0x237   : > { %v1739_v56 = vpop.f32.mrb[0].mxu0  ;;  %v1866_v62 = vmul.f32 %v1851_v55, %v1810_v51  ;;  %v1856_v4 = vsel %vm1822_vm12, %v1851_v55, 0.0 }
 0x238   : > { %v1849_v30 = vmul.f32 %v1844_v54, %v1739_v56  ;;  %v1741_v57 = vpop.f32.mrb[1].mxu0 }
 0x239   : > { %v1819_v58 = vcombine.low %v1739_v56, %v1741_v57  ;;  %v1850_v59 = vmul.f32 %v1845_v53, %v1741_v57  ;;  %v1870_v7 = vsel %vm1822_vm12, %v1866_v62, 0.0 }
 0x23a   : > { %v1864_v60 = vmul.f32 %v1849_v30, %v1739_v56  ;;  %v1853_v61 = vsel %vm364_vm2, %v1849_v30, 0.0 }
 0x23b   : > { %1821 = vst [vmem:[%s2239_s10] sm:$0xff] %v1819_v58  ;;  %v1854_v63 = vsel %vm364_vm2, %v1850_v59, 0.0  ;;  %v1865_v0 = vmul.f32 %v1850_v59, %v1741_v57 }
 0x23c   : > { %v1855_v1 = vadd.f32 %v1854_v63, %v1853_v61  ;;  %v1867_v2 = vsel %vm364_vm2, %v1864_v60, 0.0 }
 0x23d   : > { %v1868_v3 = vsel %vm364_vm2, %v1865_v0, 0.0 }
 0x23e   : > { %v1857_v5 = vadd.f32 %v1856_v4, %v1855_v1  ;;  %v1869_v6 = vadd.f32 %v1868_v3, %v1867_v2 }
 0x240   : > { %1858 = vadd.xlane.f32.xlu1 %v1857_v5  ;;  %v1871_v8 = vadd.f32 %v1870_v7, %v1869_v6 }
 0x242   : > { %1872 = vadd.xlane.f32.xlu0 %v1871_v8 }
 0x2cd   : > { %v1859_v10 = vpop.xlane.xlu1 %1858 }
 0x2ce   : > { %v1860_v12 = vadd.f32 %v1859_v10, %v1852_v9 }
 0x2cf   : > { %v1873_v13 = vpop.xlane.xlu0 %1872 }
 0x2d0   : > { %1862 = vst.msk [vmem:[%s2419_s6] sm:$0xf] %vm1861_vm13, %v1860_v12  ;;  %v1874_v14 = vadd.f32 %v1873_v13, %v1863_v11 }
 0x2d2   : > { %1875 = vst.msk [vmem:[%s2420_s7] sm:$0xf] %vm1861_vm13, %v1874_v14 }
 0x2d3 PF: > { %s18_s24 = sadd.s32 1, %s2170_s24  }
 0x2d4   : > { %p15_p5 = scmp.ge.s32.totalorder %s18_s24, 4  }
 0x2d6   :  { %17 = sbr.rel (!%p15_p5) target bundleno = 1 (0x1), region = 98 }

</bundles_post_ra>
